<compile_context>
chip_gen: v6e
topology: v6e:2x2x1
jax: 0.10.0
libtpu: 0.0.40
codegen_flags: <defaults>
</compile_context>

<pallas_src>
import jax
import jax.numpy as jnp
from jax.experimental import pallas as pl
from jax.experimental.pallas import tpu as pltpu

# ---- model hyper-params (PyTorch defaults of TabTransformer) ----------------
NUM_FEATURES = 16
NUM_CLASSES = 3
DIM_EMB = 64
NUM_HEADS = 4          # numerically irrelevant: softmax over one key == 1 per head
NUM_LAYERS = 4
DIM_FF = 2048          # nn.TransformerEncoderLayer default dim_feedforward
LN_EPS = 1e-5
BATCH = 4

C_PAD = 128            # lane-dense classifier output slab width
SUBLANE_BF16 = 16      # bf16 sublane packing -> pad batch to 16 rows


def _round_up(n, m):
    return -(-n // m) * m


# -----------------------------------------------------------------------------
# Kernel: one grid step == one encoder layer; h persists in VMEM scratch.
# -----------------------------------------------------------------------------
def tab_transformer_kernel(x_ref, emb_w_ref, emb_b_ref,
                           watt_ref, w1_ref, b1_ref, w2_ref, small_ref,
                           cls_w_ref, cls_b_ref,
                           out_ref, h_ref):
    l = pl.program_id(0)

    def layer_norm(h, g, b):
        mu = jnp.mean(h, axis=-1, keepdims=True)
        var = jnp.mean((h - mu) ** 2, axis=-1, keepdims=True)  # biased, like nn.LayerNorm
        return (h - mu) * jax.lax.rsqrt(var + LN_EPS) * g + b

    @pl.when(l == 0)
    def _():
        # embedding: (B, F) @ (F, E) + (1, E)   (f32, tiny)
        h_ref[...] = (jnp.dot(x_ref[...], emb_w_ref[...],
                              preferred_element_type=jnp.float32)
                      + emb_b_ref[...])

    h = h_ref[...]                                  # f32 (B_pad, E)

    # coalesced per-layer small tensors: one (8, E) f32 tile
    small = small_ref[0]
    b_att = small[0:1, :]
    ln1g, ln1b = small[1:2, :], small[2:3, :]
    ln2g, ln2b = small[3:4, :], small[4:5, :]
    b2 = small[5:6, :]

    # --- self-attention (seq_len == 1) with residual folded into W_att' = Wv@Wo + I
    attn = jnp.dot(h.astype(jnp.bfloat16), watt_ref[0],
                   preferred_element_type=jnp.float32) + b_att
    h = layer_norm(attn, ln1g, ln1b)                # post-norm (norm_first=False)

    # --- feed-forward: Linear -> ReLU -> Linear, native bf16 x bf16 -> f32 MXU
    ff = jnp.dot(h.astype(jnp.bfloat16), w1_ref[0],
                 preferred_element_type=jnp.float32) + b1_ref[0]
    ff = jnp.maximum(ff, 0.0)
    ff = jnp.dot(ff.astype(jnp.bfloat16), w2_ref[0],
                 preferred_element_type=jnp.float32) + b2
    h = layer_norm(h + ff, ln2g, ln2b)

    h_ref[...] = h

    @pl.when(l == pl.num_programs(0) - 1)
    def _():
        # classifier head into a lane-dense (B_pad, 128) slab (unmasked vst)
        out_ref[...] = (jnp.dot(h, cls_w_ref[...],
                                preferred_element_type=jnp.float32)
                        + cls_b_ref[...]).astype(out_ref.dtype)


# -----------------------------------------------------------------------------
# Parameters (synthetic, PyTorch (out,in) layout) + one-time repacking.
# -----------------------------------------------------------------------------
def make_params(key):
    """Deterministic synthetic parameters, stored in PyTorch (out,in) layout."""
    ks = jax.random.split(key, 16)
    u = lambda k, shape, fan_in: jax.random.uniform(
        k, shape, jnp.float32, -1.0 / jnp.sqrt(fan_in), 1.0 / jnp.sqrt(fan_in))

    p = {}
    p["emb_w"] = u(ks[0], (DIM_EMB, NUM_FEATURES), NUM_FEATURES)       # (E, F)
    p["emb_b"] = u(ks[1], (DIM_EMB,), NUM_FEATURES)
    p["in_proj_w"] = u(ks[2], (NUM_LAYERS, 3 * DIM_EMB, DIM_EMB), DIM_EMB)
    p["in_proj_b"] = u(ks[3], (NUM_LAYERS, 3 * DIM_EMB), DIM_EMB)
    p["out_proj_w"] = u(ks[4], (NUM_LAYERS, DIM_EMB, DIM_EMB), DIM_EMB)
    p["out_proj_b"] = u(ks[5], (NUM_LAYERS, DIM_EMB), DIM_EMB)
    p["lin1_w"] = u(ks[6], (NUM_LAYERS, DIM_FF, DIM_EMB), DIM_EMB)
    p["lin1_b"] = u(ks[7], (NUM_LAYERS, DIM_FF), DIM_EMB)
    p["lin2_w"] = u(ks[8], (NUM_LAYERS, DIM_EMB, DIM_FF), DIM_FF)
    p["lin2_b"] = u(ks[9], (NUM_LAYERS, DIM_EMB), DIM_FF)
    p["ln1_g"] = jnp.ones((NUM_LAYERS, DIM_EMB), jnp.float32)           # nn.LayerNorm init
    p["ln1_b"] = jnp.zeros((NUM_LAYERS, DIM_EMB), jnp.float32)
    p["ln2_g"] = jnp.ones((NUM_LAYERS, DIM_EMB), jnp.float32)
    p["ln2_b"] = jnp.zeros((NUM_LAYERS, DIM_EMB), jnp.float32)
    p["cls_w"] = u(ks[10], (NUM_CLASSES, DIM_EMB), DIM_EMB)
    p["cls_b"] = u(ks[11], (NUM_CLASSES,), DIM_EMB)
    return p


def pack_params(p):
    """One-time repack, called OUTSIDE the jitted call path.

    (out,in) -> (in,out) layouts, degenerate-attention + residual fold,
    bf16 matmul weights, coalesced small per-layer tensors, lane-padded
    classifier.  Returns contiguous device arrays.
    """
    L, E, FF, C = NUM_LAYERS, DIM_EMB, DIM_FF, NUM_CLASSES

    wv = jnp.transpose(p["in_proj_w"][:, 2 * E:3 * E, :], (0, 2, 1))    # (L, E, E) (in,out)
    bv = p["in_proj_b"][:, 2 * E:3 * E]                                 # (L, E)
    wo = jnp.transpose(p["out_proj_w"], (0, 2, 1))                      # (L, E, E) (in,out)
    bo = p["out_proj_b"]                                                # (L, E)
    # fold attention AND first residual:
    #   h + attn(h) = h @ (Wv@Wo + I) + (bv@Wo + bo)
    w_att = (jnp.einsum("lij,ljk->lik", wv, wo)
             + jnp.eye(E, dtype=jnp.float32)[None]).astype(jnp.bfloat16)
    b_att = jnp.einsum("li,lij->lj", bv, wo) + bo                       # (L, E)

    # coalesced per-layer small tensors -> one (L, 8, E) f32 sublane tile
    small = jnp.stack(
        [b_att, p["ln1_g"], p["ln1_b"], p["ln2_g"], p["ln2_b"], p["lin2_b"],
         jnp.zeros((L, E), jnp.float32), jnp.zeros((L, E), jnp.float32)],
        axis=1)                                                         # (L, 8, E)

    cls_w = jnp.zeros((E, C_PAD), jnp.float32).at[:, :C].set(p["cls_w"].T)
    cls_b = jnp.zeros((1, C_PAD), jnp.float32).at[:, :C].set(p["cls_b"])

    packed = dict(
        emb_w=p["emb_w"].T,                                             # (F, E) f32
        emb_b=p["emb_b"].reshape(1, E),
        w_att=w_att,                                                    # (L, E, E) bf16
        w1=jnp.transpose(p["lin1_w"], (0, 2, 1)).astype(jnp.bfloat16),  # (L, E, FF) bf16
        b1=p["lin1_b"].reshape(L, 1, FF),                               # (L, 1, FF) f32
        w2=jnp.transpose(p["lin2_w"], (0, 2, 1)).astype(jnp.bfloat16),  # (L, FF, E) bf16
        small=small,                                                    # (L, 8, E) f32
        cls_w=cls_w, cls_b=cls_b,
    )
    # materialize contiguously on device now, once
    return jax.tree_util.tree_map(lambda a: jax.block_until_ready(jnp.asarray(a)), packed)


# -----------------------------------------------------------------------------
# Wrapper
# -----------------------------------------------------------------------------
@jax.jit
def tab_transformer_pallas(x, packed):
    B = x.shape[0]
    B_pad = _round_up(max(B, SUBLANE_BF16), SUBLANE_BF16)
    x_pad = jnp.pad(x, ((0, B_pad - B), (0, 0)))

    const = lambda shape: pl.BlockSpec(shape, lambda l: (0, 0))
    per_layer = lambda shape: pl.BlockSpec((1,) + shape, lambda l: (l, 0, 0))

    grid_spec = pltpu.PrefetchScalarGridSpec(
        num_scalar_prefetch=0,
        grid=(NUM_LAYERS,),
        in_specs=[
            const((B_pad, NUM_FEATURES)),           # x
            const((NUM_FEATURES, DIM_EMB)),         # emb_w
            const((1, DIM_EMB)),                    # emb_b
            per_layer((DIM_EMB, DIM_EMB)),          # w_att (bf16, residual folded)
            per_layer((DIM_EMB, DIM_FF)),           # w1 (bf16)
            per_layer((1, DIM_FF)),                 # b1 (f32)
            per_layer((DIM_FF, DIM_EMB)),           # w2 (bf16)
            per_layer((8, DIM_EMB)),                # small: b_att/ln1/ln2/b2 coalesced
            const((DIM_EMB, C_PAD)),                # cls_w (lane-padded)
            const((1, C_PAD)),                      # cls_b
        ],
        out_specs=pl.BlockSpec((B_pad, C_PAD), lambda l: (0, 0)),
        scratch_shapes=[pltpu.VMEM((B_pad, DIM_EMB), jnp.float32)],     # persistent h
    )

    out = pl.pallas_call(
        tab_transformer_kernel,
        out_shape=jax.ShapeDtypeStruct((B_pad, C_PAD), jnp.float32),
        grid_spec=grid_spec,
        compiler_params=pltpu.CompilerParams(
            dimension_semantics=("arbitrary",),      # layer axis carries h sequentially
            vmem_limit_bytes=16 * 1024 * 1024,       # right-sized (v7x TC = 64 MiB total)
        ),
    )(x_pad, packed["emb_w"], packed["emb_b"],
      packed["w_att"], packed["w1"], packed["b1"], packed["w2"], packed["small"],
      packed["cls_w"], packed["cls_b"])
    return out[:B, :NUM_CLASSES]


# -----------------------------------------------------------------------------
# Pure-JAX reference (same packed params, same bf16 matmul / eval semantics)
# -----------------------------------------------------------------------------
def tab_transformer_ref(x, packed):
    def ln(h, g, b):
        mu = jnp.mean(h, axis=-1, keepdims=True)
        var = jnp.mean((h - mu) ** 2, axis=-1, keepdims=True)
        return (h - mu) * jax.lax.rsqrt(var + LN_EPS) * g + b

    h = x @ packed["emb_w"] + packed["emb_b"]
    for l in range(NUM_LAYERS):
        small = packed["small"][l]
        b_att = small[0:1]
        ln1g, ln1b, ln2g, ln2b, b2 = small[1:2], small[2:3], small[3:4], small[4:5], small[5:6]
        attn = jnp.dot(h.astype(jnp.bfloat16), packed["w_att"][l],
                       preferred_element_type=jnp.float32) + b_att
        h = ln(attn, ln1g, ln1b)
        ff = jnp.dot(h.astype(jnp.bfloat16), packed["w1"][l],
                     preferred_element_type=jnp.float32) + packed["b1"][l]
        ff = jnp.maximum(ff, 0.0)
        ff = jnp.dot(ff.astype(jnp.bfloat16), packed["w2"][l],
                     preferred_element_type=jnp.float32) + b2
        h = ln(h + ff, ln2g, ln2b)
    return (h @ packed["cls_w"] + packed["cls_b"])[:, :NUM_CLASSES]


if __name__ == "__main__":
    key = jax.random.PRNGKey(0)
    kx, kp = jax.random.split(key)
    x = jax.random.normal(kx, (BATCH, NUM_FEATURES), jnp.float32)

    packed = pack_params(make_params(kp))   # one-time repack, outside the call path

    out = jax.block_until_ready(tab_transformer_pallas(x, packed))
    ref = tab_transformer_ref(x, packed)

    assert out.shape == (BATCH, NUM_CLASSES), out.shape
    assert jnp.allclose(out, ref, atol=2e-3, rtol=2e-3), (out, ref)
    print("KERNEL_OK")
</pallas_src>

<mosaic_0001>
module attributes {stable_mosaic.version = 11 : i64} {
  func.func @tab_transformer_kernel(%arg0: i32, %arg1: memref<16x16xf32, #tpu.memory_space<vmem>>, %arg2: memref<16x64xf32, #tpu.memory_space<vmem>>, %arg3: memref<1x64xf32, #tpu.memory_space<vmem>>, %arg4: memref<1x64x64xbf16, #tpu.memory_space<vmem>>, %arg5: memref<1x64x2048xbf16, #tpu.memory_space<vmem>>, %arg6: memref<1x1x2048xf32, #tpu.memory_space<vmem>>, %arg7: memref<1x2048x64xbf16, #tpu.memory_space<vmem>>, %arg8: memref<1x8x64xf32, #tpu.memory_space<vmem>>, %arg9: memref<64x128xf32, #tpu.memory_space<vmem>>, %arg10: memref<1x128xf32, #tpu.memory_space<vmem>>, %arg11: memref<16x128xf32, #tpu.memory_space<vmem>>, %arg12: memref<16x64xf32, #tpu.memory_space<vmem>>) attributes {dimension_semantics = [#tpu.dimension_semantics<arbitrary>], iteration_bounds = array<i64: 4>, scalar_prefetch = 0 : i64, scratch_operands = 1 : i64, tpu.core_type = #tpu.core_type<tc>, window_params = [{pipeline_mode = #tpu.pipeline_mode<synchronous>, transform_indices = @transform_0, window_bounds = array<i64: 16, 16>}, {pipeline_mode = #tpu.pipeline_mode<synchronous>, transform_indices = @transform_1, window_bounds = array<i64: 16, 64>}, {pipeline_mode = #tpu.pipeline_mode<synchronous>, transform_indices = @transform_2, window_bounds = array<i64: 1, 64>}, {transform_indices = @transform_3, window_bounds = array<i64: 1, 64, 64>}, {transform_indices = @transform_4, window_bounds = array<i64: 1, 64, 2048>}, {transform_indices = @transform_5, window_bounds = array<i64: 1, 1, 2048>}, {transform_indices = @transform_6, window_bounds = array<i64: 1, 2048, 64>}, {transform_indices = @transform_7, window_bounds = array<i64: 1, 8, 64>}, {pipeline_mode = #tpu.pipeline_mode<synchronous>, transform_indices = @transform_8, window_bounds = array<i64: 64, 128>}, {pipeline_mode = #tpu.pipeline_mode<synchronous>, transform_indices = @transform_9, window_bounds = array<i64: 1, 128>}, {pipeline_mode = #tpu.pipeline_mode<synchronous>, transform_indices = @transform_10, window_bounds = array<i64: 16, 128>}]} {
    %c0_i32 = arith.constant 0 : i32
    %0 = arith.cmpi eq, %arg0, %c0_i32 : i32
    %1 = arith.extui %0 : i1 to i32
    %c0_i32_0 = arith.constant 0 : i32
    %2 = arith.cmpi ne, %1, %c0_i32_0 : i32
    scf.if %2 {
      %c0_33 = arith.constant 0 : index
      %c0_34 = arith.constant 0 : index
      %83 = vector.load %arg1[%c0_33, %c0_34] : memref<16x16xf32, #tpu.memory_space<vmem>>, vector<16x16xf32>
      %c0_35 = arith.constant 0 : index
      %c0_36 = arith.constant 0 : index
      %84 = vector.load %arg2[%c0_35, %c0_36] : memref<16x64xf32, #tpu.memory_space<vmem>>, vector<16x64xf32>
      %cst_37 = arith.constant dense<0.000000e+00> : vector<16x64xf32>
      %85 = tpu.matmul %83, %84, %cst_37 {dimension_numbers = #tpu.dot_dimension_numbers<[1], [0], [0], [1], [0, 0, 1, 1], [], []>} : vector<16x16xf32>, vector<16x64xf32>, vector<16x64xf32> -> vector<16x64xf32>
      %c0_38 = arith.constant 0 : index
      %c0_39 = arith.constant 0 : index
      %86 = vector.load %arg3[%c0_38, %c0_39] : memref<1x64xf32, #tpu.memory_space<vmem>>, vector<1x64xf32>
      %87 = vector.broadcast %86 : vector<1x64xf32> to vector<16x64xf32>
      %88 = arith.addf %85, %87 : vector<16x64xf32>
      %c0_40 = arith.constant 0 : index
      %c0_41 = arith.constant 0 : index
      %89 = vector.load %arg12[%c0_40, %c0_41] : memref<16x64xf32, #tpu.memory_space<vmem>>, vector<16x64xf32>
      tpu.vector_store %arg12[%c0_40, %c0_41], %88 {strides = array<i32>} : memref<16x64xf32, #tpu.memory_space<vmem>>, vector<16x64xf32>,
    } else {
    }
    %c0 = arith.constant 0 : index
    %c0_1 = arith.constant 0 : index
    %3 = vector.load %arg12[%c0, %c0_1] : memref<16x64xf32, #tpu.memory_space<vmem>>, vector<16x64xf32>
    %c0_2 = arith.constant 0 : index
    %c0_3 = arith.constant 0 : index
    %c0_4 = arith.constant 0 : index
    %4 = vector.load %arg8[%c0_2, %c0_3, %c0_4] : memref<1x8x64xf32, #tpu.memory_space<vmem>>, vector<1x8x64xf32>
    %5 = vector.shape_cast %4 : vector<1x8x64xf32> to vector<8x64xf32>
    %6 = vector.extract_strided_slice %5 {offsets = [0, 0], sizes = [1, 64], strides = [1, 1]} : vector<8x64xf32> to vector<1x64xf32>
    %7 = vector.extract_strided_slice %5 {offsets = [1, 0], sizes = [1, 64], strides = [1, 1]} : vector<8x64xf32> to vector<1x64xf32>
    %8 = vector.extract_strided_slice %5 {offsets = [2, 0], sizes = [1, 64], strides = [1, 1]} : vector<8x64xf32> to vector<1x64xf32>
    %9 = vector.extract_strided_slice %5 {offsets = [3, 0], sizes = [1, 64], strides = [1, 1]} : vector<8x64xf32> to vector<1x64xf32>
    %10 = vector.extract_strided_slice %5 {offsets = [4, 0], sizes = [1, 64], strides = [1, 1]} : vector<8x64xf32> to vector<1x64xf32>
    %11 = vector.extract_strided_slice %5 {offsets = [5, 0], sizes = [1, 64], strides = [1, 1]} : vector<8x64xf32> to vector<1x64xf32>
    %12 = arith.truncf %3 : vector<16x64xf32> to vector<16x64xbf16>
    %c0_5 = arith.constant 0 : index
    %c0_6 = arith.constant 0 : index
    %c0_7 = arith.constant 0 : index
    %13 = vector.load %arg4[%c0_5, %c0_6, %c0_7] : memref<1x64x64xbf16, #tpu.memory_space<vmem>>, vector<1x64x64xbf16>
    %14 = vector.shape_cast %13 : vector<1x64x64xbf16> to vector<64x64xbf16>
    %cst = arith.constant dense<0.000000e+00> : vector<16x64xf32>
    %15 = tpu.matmul %12, %14, %cst {dimension_numbers = #tpu.dot_dimension_numbers<[1], [0], [0], [1], [0, 0, 1, 1], [], []>} : vector<16x64xbf16>, vector<64x64xbf16>, vector<16x64xf32> -> vector<16x64xf32>
    %16 = vector.broadcast %6 : vector<1x64xf32> to vector<16x64xf32>
    %17 = arith.addf %15, %16 : vector<16x64xf32>
    %cst_8 = arith.constant dense<0.000000e+00> : vector<16xf32>
    %18 = vector.multi_reduction <add>, %17, %cst_8 [1] : vector<16x64xf32> to vector<16xf32>
    %19 = vector.shape_cast %18 : vector<16xf32> to vector<16x1xf32>
    %cst_9 = arith.constant 6.400000e+01 : f32
    %20 = vector.broadcast %cst_9 : f32 to vector<16x1xf32>
    %21 = arith.divf %19, %20 : vector<16x1xf32>
    %22 = vector.broadcast %21 : vector<16x1xf32> to vector<16x64xf32>
    %23 = arith.subf %17, %22 : vector<16x64xf32>
    %24 = arith.mulf %23, %23 : vector<16x64xf32>
    %cst_10 = arith.constant dense<0.000000e+00> : vector<16xf32>
    %25 = vector.multi_reduction <add>, %24, %cst_10 [1] : vector<16x64xf32> to vector<16xf32>
    %26 = vector.shape_cast %25 : vector<16xf32> to vector<16x1xf32>
    %cst_11 = arith.constant 6.400000e+01 : f32
    %27 = vector.broadcast %cst_11 : f32 to vector<16x1xf32>
    %28 = arith.divf %26, %27 : vector<16x1xf32>
    %29 = vector.broadcast %21 : vector<16x1xf32> to vector<16x64xf32>
    %30 = arith.subf %17, %29 : vector<16x64xf32>
    %cst_12 = arith.constant 9.99999974E-6 : f32
    %31 = vector.broadcast %cst_12 : f32 to vector<16x1xf32>
    %32 = arith.addf %28, %31 : vector<16x1xf32>
    %33 = math.rsqrt %32 : vector<16x1xf32>
    %34 = vector.broadcast %33 : vector<16x1xf32> to vector<16x64xf32>
    %35 = arith.mulf %30, %34 : vector<16x64xf32>
    %36 = vector.broadcast %7 : vector<1x64xf32> to vector<16x64xf32>
    %37 = arith.mulf %35, %36 : vector<16x64xf32>
    %38 = vector.broadcast %8 : vector<1x64xf32> to vector<16x64xf32>
    %39 = arith.addf %37, %38 : vector<16x64xf32>
    %40 = arith.truncf %39 : vector<16x64xf32> to vector<16x64xbf16>
    %c0_13 = arith.constant 0 : index
    %c0_14 = arith.constant 0 : index
    %c0_15 = arith.constant 0 : index
    %41 = vector.load %arg5[%c0_13, %c0_14, %c0_15] : memref<1x64x2048xbf16, #tpu.memory_space<vmem>>, vector<1x64x2048xbf16>
    %42 = vector.shape_cast %41 : vector<1x64x2048xbf16> to vector<64x2048xbf16>
    %cst_16 = arith.constant dense<0.000000e+00> : vector<16x2048xf32>
    %43 = tpu.matmul %40, %42, %cst_16 {dimension_numbers = #tpu.dot_dimension_numbers<[1], [0], [0], [1], [0, 0, 1, 1], [], []>} : vector<16x64xbf16>, vector<64x2048xbf16>, vector<16x2048xf32> -> vector<16x2048xf32>
    %c0_17 = arith.constant 0 : index
    %c0_18 = arith.constant 0 : index
    %c0_19 = arith.constant 0 : index
    %44 = vector.load %arg6[%c0_17, %c0_18, %c0_19] : memref<1x1x2048xf32, #tpu.memory_space<vmem>>, vector<1x1x2048xf32>
    %45 = vector.shape_cast %44 : vector<1x1x2048xf32> to vector<1x2048xf32>
    %46 = vector.broadcast %45 : vector<1x2048xf32> to vector<16x2048xf32>
    %47 = arith.addf %43, %46 : vector<16x2048xf32>
    %cst_20 = arith.constant 0.000000e+00 : f32
    %48 = vector.broadcast %cst_20 : f32 to vector<16x2048xf32>
    %49 = arith.maximumf %47, %48 : vector<16x2048xf32>
    %50 = arith.truncf %49 : vector<16x2048xf32> to vector<16x2048xbf16>
    %c0_21 = arith.constant 0 : index
    %c0_22 = arith.constant 0 : index
    %c0_23 = arith.constant 0 : index
    %51 = vector.load %arg7[%c0_21, %c0_22, %c0_23] : memref<1x2048x64xbf16, #tpu.memory_space<vmem>>, vector<1x2048x64xbf16>
    %52 = vector.shape_cast %51 : vector<1x2048x64xbf16> to vector<2048x64xbf16>
    %cst_24 = arith.constant dense<0.000000e+00> : vector<16x64xf32>
    %53 = tpu.matmul %50, %52, %cst_24 {dimension_numbers = #tpu.dot_dimension_numbers<[1], [0], [0], [1], [0, 0, 1, 1], [], []>} : vector<16x2048xbf16>, vector<2048x64xbf16>, vector<16x64xf32> -> vector<16x64xf32>
    %54 = vector.broadcast %11 : vector<1x64xf32> to vector<16x64xf32>
    %55 = arith.addf %53, %54 : vector<16x64xf32>
    %56 = arith.addf %39, %55 : vector<16x64xf32>
    %cst_25 = arith.constant dense<0.000000e+00> : vector<16xf32>
    %57 = vector.multi_reduction <add>, %56, %cst_25 [1] : vector<16x64xf32> to vector<16xf32>
    %58 = vector.shape_cast %57 : vector<16xf32> to vector<16x1xf32>
    %cst_26 = arith.constant 6.400000e+01 : f32
    %59 = vector.broadcast %cst_26 : f32 to vector<16x1xf32>
    %60 = arith.divf %58, %59 : vector<16x1xf32>
    %61 = vector.broadcast %60 : vector<16x1xf32> to vector<16x64xf32>
    %62 = arith.subf %56, %61 : vector<16x64xf32>
    %63 = arith.mulf %62, %62 : vector<16x64xf32>
    %cst_27 = arith.constant dense<0.000000e+00> : vector<16xf32>
    %64 = vector.multi_reduction <add>, %63, %cst_27 [1] : vector<16x64xf32> to vector<16xf32>
    %65 = vector.shape_cast %64 : vector<16xf32> to vector<16x1xf32>
    %cst_28 = arith.constant 6.400000e+01 : f32
    %66 = vector.broadcast %cst_28 : f32 to vector<16x1xf32>
    %67 = arith.divf %65, %66 : vector<16x1xf32>
    %68 = vector.broadcast %60 : vector<16x1xf32> to vector<16x64xf32>
    %69 = arith.subf %56, %68 : vector<16x64xf32>
    %cst_29 = arith.constant 9.99999974E-6 : f32
    %70 = vector.broadcast %cst_29 : f32 to vector<16x1xf32>
    %71 = arith.addf %67, %70 : vector<16x1xf32>
    %72 = math.rsqrt %71 : vector<16x1xf32>
    %73 = vector.broadcast %72 : vector<16x1xf32> to vector<16x64xf32>
    %74 = arith.mulf %69, %73 : vector<16x64xf32>
    %75 = vector.broadcast %9 : vector<1x64xf32> to vector<16x64xf32>
    %76 = arith.mulf %74, %75 : vector<16x64xf32>
    %77 = vector.broadcast %10 : vector<1x64xf32> to vector<16x64xf32>
    %78 = arith.addf %76, %77 : vector<16x64xf32>
    %c0_30 = arith.constant 0 : index
    %c0_31 = arith.constant 0 : index
    %79 = vector.load %arg12[%c0_30, %c0_31] : memref<16x64xf32, #tpu.memory_space<vmem>>, vector<16x64xf32>
    tpu.vector_store %arg12[%c0_30, %c0_31], %78 {strides = array<i32>} : memref<16x64xf32, #tpu.memory_space<vmem>>, vector<16x64xf32>,
    %c3_i32 = arith.constant 3 : i32
    %80 = arith.cmpi eq, %arg0, %c3_i32 : i32
    %81 = arith.extui %80 : i1 to i32
    %c0_i32_32 = arith.constant 0 : i32
    %82 = arith.cmpi ne, %81, %c0_i32_32 : i32
    scf.if %82 {
      %c0_33 = arith.constant 0 : index
      %c0_34 = arith.constant 0 : index
      %83 = vector.load %arg9[%c0_33, %c0_34] : memref<64x128xf32, #tpu.memory_space<vmem>>, vector<64x128xf32>
      %cst_35 = arith.constant dense<0.000000e+00> : vector<16x128xf32>
      %84 = tpu.matmul %78, %83, %cst_35 {dimension_numbers = #tpu.dot_dimension_numbers<[1], [0], [0], [1], [0, 0, 1, 1], [], []>} : vector<16x64xf32>, vector<64x128xf32>, vector<16x128xf32> -> vector<16x128xf32>
      %c0_36 = arith.constant 0 : index
      %c0_37 = arith.constant 0 : index
      %85 = vector.load %arg10[%c0_36, %c0_37] : memref<1x128xf32, #tpu.memory_space<vmem>>, vector<1x128xf32>
      %86 = vector.broadcast %85 : vector<1x128xf32> to vector<16x128xf32>
      %87 = arith.addf %84, %86 : vector<16x128xf32>
      %c0_38 = arith.constant 0 : index
      %c0_39 = arith.constant 0 : index
      %88 = vector.load %arg11[%c0_38, %c0_39] : memref<16x128xf32, #tpu.memory_space<vmem>>, vector<16x128xf32>
      tpu.vector_store %arg11[%c0_38, %c0_39], %87 {strides = array<i32>} : memref<16x128xf32, #tpu.memory_space<vmem>>, vector<16x128xf32>,
    } else {
    }
    return
  }
  func.func @transform_0(%arg0: i32) -> (i32, i32) {
    %c0_i32 = arith.constant 0 : i32
    %c0_i32_0 = arith.constant 0 : i32
    %c0_i32_1 = arith.constant 0 : i32
    return %c0_i32, %c0_i32_0 : i32, i32
  }
  func.func @transform_1(%arg0: i32) -> (i32, i32) {
    %c0_i32 = arith.constant 0 : i32
    %c0_i32_0 = arith.constant 0 : i32
    %c0_i32_1 = arith.constant 0 : i32
    return %c0_i32, %c0_i32_0 : i32, i32
  }
  func.func @transform_2(%arg0: i32) -> (i32, i32) {
    %c0_i32 = arith.constant 0 : i32
    %c0_i32_0 = arith.constant 0 : i32
    %c0_i32_1 = arith.constant 0 : i32
    return %c0_i32, %c0_i32_0 : i32, i32
  }
  func.func @transform_3(%arg0: i32) -> (i32, i32, i32) {
    %c0_i32 = arith.constant 0 : i32
    %c0_i32_0 = arith.constant 0 : i32
    %c0_i32_1 = arith.constant 0 : i32
    return %arg0, %c0_i32, %c0_i32_0 : i32, i32, i32
  }
  func.func @transform_4(%arg0: i32) -> (i32, i32, i32) {
    %c0_i32 = arith.constant 0 : i32
    %c0_i32_0 = arith.constant 0 : i32
    %c0_i32_1 = arith.constant 0 : i32
    return %arg0, %c0_i32, %c0_i32_0 : i32, i32, i32
  }
  func.func @transform_5(%arg0: i32) -> (i32, i32, i32) {
    %c0_i32 = arith.constant 0 : i32
    %c0_i32_0 = arith.constant 0 : i32
    %c0_i32_1 = arith.constant 0 : i32
    return %arg0, %c0_i32, %c0_i32_0 : i32, i32, i32
  }
  func.func @transform_6(%arg0: i32) -> (i32, i32, i32) {
    %c0_i32 = arith.constant 0 : i32
    %c0_i32_0 = arith.constant 0 : i32
    %c0_i32_1 = arith.constant 0 : i32
    return %arg0, %c0_i32, %c0_i32_0 : i32, i32, i32
  }
  func.func @transform_7(%arg0: i32) -> (i32, i32, i32) {
    %c0_i32 = arith.constant 0 : i32
    %c0_i32_0 = arith.constant 0 : i32
    %c0_i32_1 = arith.constant 0 : i32
    return %arg0, %c0_i32, %c0_i32_0 : i32, i32, i32
  }
  func.func @transform_8(%arg0: i32) -> (i32, i32) {
    %c0_i32 = arith.constant 0 : i32
    %c0_i32_0 = arith.constant 0 : i32
    %c0_i32_1 = arith.constant 0 : i32
    return %c0_i32, %c0_i32_0 : i32, i32
  }
  func.func @transform_9(%arg0: i32) -> (i32, i32) {
    %c0_i32 = arith.constant 0 : i32
    %c0_i32_0 = arith.constant 0 : i32
    %c0_i32_1 = arith.constant 0 : i32
    return %c0_i32, %c0_i32_0 : i32, i32
  }
  func.func @transform_10(%arg0: i32) -> (i32, i32) {
    %c0_i32 = arith.constant 0 : i32
    %c0_i32_0 = arith.constant 0 : i32
    %c0_i32_1 = arith.constant 0 : i32
    return %c0_i32, %c0_i32_0 : i32, i32
  }
}

</mosaic_0001>

<bundles_post_ra>
// kernel: tab_transformer_pallas.1
= control target key start
LH: loop header
LB: loop body
LE: loop exit
PB: predicated region body
PF: predicated region fallthrough
CT: control target
= control target key end

     0   :  { %s3765_s13 = smov 0   ;;  %s4224_s0 = inlined_call_operand.vmem [shape: f32[16,16], index: 0, kind: input, shape index: {}]   ;;  %s4225_s1 = inlined_call_operand.vmem [shape: f32[16,64], index: 1, kind: input, shape index: {}]   ;;  %s4226_s2 = inlined_call_operand.vmem [shape: f32[1,64], index: 2, kind: input, shape index: {}]   ;;  %s4227_s3 = inlined_call_operand.vmem [shape: bf16[4,64,64], index: 3, kind: input, shape index: {}]   ;;  %s4228_s4 = inlined_call_operand.vmem [shape: bf16[4,64,2048], index: 4, kind: input, shape index: {}]   ;;  %s4229_s5 = inlined_call_operand.vmem [shape: f32[4,1,2048], index: 5, kind: input, shape index: {}]   ;;  %s4230_s6 = inlined_call_operand.vmem [shape: bf16[4,2048,64], index: 6, kind: input, shape index: {}]   ;;  %s4231_s7 = inlined_call_operand.vmem [shape: f32[4,8,64], index: 7, kind: input, shape index: {}]   ;;  %s4232_s8 = inlined_call_operand.vmem [shape: f32[64,128], index: 8, kind: input, shape index: {}]   ;;  %s4233_s9 = inlined_call_operand.vmem [shape: f32[1,128], index: 9, kind: input, shape index: {}]   ;;  %s4234_s10 = inlined_call_operand.vmem [shape: f32[16,128], index: 10, kind: output, shape index: {}]  }
   0x1 LB: > { %s3771_s14 = sadd.s32 4294967295, %s3705_s13   ;;  %p3087_p0 = scmp.ge.s32.totalorder %s3705_s13, 1  ;;  %s3705_s13 = sphi %s3765_s13, %s20_s13  }
   0x2   : > { %p345_p1 = scmp.lt.s32.totalorder %s3705_s13, 5 }
   0x4   : > { %p346_p2 = pnand %p3087_p0, %p345_p1 }
   0x5   : > { %p396_p3 = scmp.lt.s32.totalorder (!%p346_p2), %s3771_s14, 3  ;;  %p3096_p4 = scmp.ne.s32.totalorder (!%p346_p2), %s3771_s14, 0 }
   0x6   : > { %349 = sbr.rel (%p346_p2) target bundleno = 1784 (0x6f8), region = 60 }
   0xb   : > { %s397_s15 = scalar_select %p396_p3, %s3771_s14, 3 }
   0xd   : > { %s3311_s16 = sshll.u32 %s397_s15, 5  ;;  %s3312_s17 = sshll.u32 %s397_s15, 9 }
   0xe   : > { %s3780_s20 = scalar_lea.vmem %s4227_s3, %s3311_s16  ;;  %s3785_s23 = scalar_lea.vmem %s4228_s4, %s3312_s17 }
   0xf   : > { %s3092_s24 = sshll.u32 %s397_s15, 4  ;;  %s3313_s25 = sshll.u32 %s397_s15, 10 }
  0x10   : > { %s3790_s28 = scalar_lea.vmem %s4229_s5, %s3092_s24  ;;  %s3795_s11 = scalar_lea.vmem %s4230_s6, %s3313_s25 }
  0x11   : > { %s3095_s12 = sshll.u32 %s397_s15, 3  ;;  %423 = sbr.rel (%p3096_p4) target bundleno = 225 (0xe1), region = 64 }
  0x12   : > { %s3800_s19 = scalar_lea.vmem %s4231_s7, %s3095_s12 }
  0x16   : > { %v427_v0 = vld [vmem:[%s4225_s1 + $0x8] sm:$0xff]  ;;  %v426_v1 = vld [vmem:[%s4225_s1] sm:$0xff]  ;;  %vm435_vm0 = vcmask 130048   ;;  %vm517_vm1 = vcmask 523264  }
  0x17   : > { %v424_v2 = vld [vmem:[%s4224_s0] sm:$0xff]  ;;  %3509 = vmatprep.subr.mxu0 %v427_v0  ;;  %v425_v3 = vld [vmem:[%s4224_s0 + $0x8] sm:$0xff] }
  0x18   : > { %3513 = vmatprep.mubr.msk.f32.mxu0 %vm435_vm0, %v424_v2  ;;  %3510 = vmatpush3.msra.mxu0 %v427_v0  ;;  %v3097_v4 = vld [vmem:[%s4226_s2] ss:$0 sm:$0xff] }
  0x19   : > { %3511 = vmatprep.subr.mxu0 %v426_v1 }
  0x1a   : > { %3512 = vmatpush3.msra.mxu0 %v426_v1 }
  0x1b   : > { %3514 = vmatmul.mubr.msk.f32.vlgmr.msra.gmra.mxu0 %vm435_vm0, %v425_v3 }
  0xdb   : > { %v3515_v5 = vpop.f32.mrf.mxu0 }
  0xdc   : > { %v514_v6 = vadd.f32 %v3515_v5, %v3097_v4 }
  0xdd   : > { %v508_v7 = vpop.f32.mrf.mxu0 }
  0xde   : > { %519 = vst.msk [vmem:[#allocation2 + $0x8] sm:$0xff] %vm517_vm1, %v514_v6  ;;  %v509_v8 = vadd.f32 %v3097_v4, %v508_v7 }
  0xe0   : > { %518 = vst.msk [vmem:[#allocation2] sm:$0xff] %vm517_vm1, %v509_v8 }
  0xe1 PF: > { %v3558_v9 = vld [vmem:[%s3780_s20 + $0x18] sm:$0xff]   ;;  %v3707_v10 = vmov 0.0   ;;  %v3559_v11 = vld [vmem:[%s3780_s20 + $0x10] sm:$0xff]   ;;  %vm3708_vm2 = vmmov 0   ;;  %v3560_v12 = vld [vmem:[%s3780_s20 + $0x8] sm:$0xff]   ;;  %vm560_vm3 = vcmask 523264   ;;  %v532_v17 = vlaneseq }
  0xe2   : > { %3516 = vmatprep.subr.bf16.mxu0 %v3707_v10  ;;  %3524 = vmatprep.mubr.msk.bf16.mxu0 %vm3708_vm2, %v3707_v10  ;;  %v3561_v13 = vld [vmem:[%s3780_s20] sm:$0xff]   ;;  %v694_v42 = vld [vmem:[%s3785_s23 + $0x188] sm:$0xff]  ;;  %v695_v8 = vld [vmem:[%s3785_s23 + $0x190] sm:$0xff]  ;;  %p3305_p5 = scmp.ne.s32.totalorder %s3771_s14, 3 }
  0xe3   : > { %3517 = vmatpush3.bf16.msra.mxu0 %v3558_v9  ;;  %v3823_v18 = vshrl.u32 %v532_v17, 7  ;;  %v3829_v20 = vld [vmem:[%s3800_s19] sm:$0xff]  ;;  %v702_v44 = vld [vmem:[%s3785_s23 + $0x1c8] sm:$0xff]  ;;  %v703_v9 = vld [vmem:[%s3785_s23 + $0x1d0] sm:$0xff] }
  0xe4   : > { %3518 = vmatprep.subr.bf16.mxu0 %v3707_v10  ;;  %v693_v40 = vld [vmem:[%s3785_s23 + $0x180] sm:$0xff]  ;;  %v3155_v45 = vcombine.low %v694_v42, %v702_v44  ;;  %v3156_v46 = vcombine.high %v694_v42, %v702_v44  ;;  %v678_v50 = vld [vmem:[%s3785_s23 + $0x108] sm:$0xff] }
  0xe5   : > { %v521_v15 = vld [vmem:[#allocation2 + $0x8] sm:$0xff]  ;;  %v3826_v19 = vsub.s32 0, %v3823_v18  ;;  %v701_v41 = vld [vmem:[%s3785_s23 + $0x1c0] sm:$0xff] }
  0xe6   : > { %v3154_v43 = vcombine.high %v693_v40, %v701_v41  ;;  %v3153_v47 = vcombine.low %v693_v40, %v701_v41  ;;  %v677_v48 = vld [vmem:[%s3785_s23 + $0x100] sm:$0xff]  ;;  %v686_v52 = vld [vmem:[%s3785_s23 + $0x148] sm:$0xff]  ;;  %v680_v40 = vld [vmem:[%s3785_s23 + $0x118] sm:$0xff] }
  0xe7   : > { %3519 = vmatpush3.bf16.msra.mxu0 %v3559_v11  ;;  %v520_v14 = vld [vmem:[#allocation2] sm:$0xff]  ;;  %v535_v21 = vrot.slane %v3829_v20, %v3826_v19  ;;  %v3139_v53 = vcombine.low %v678_v50, %v686_v52  ;;  %v3140_v54 = vcombine.high %v678_v50, %v686_v52  ;;  %v662_v58 = vld [vmem:[%s3785_s23 + $0x88] sm:$0xff]  ;;  %v3158_v11 = vcombine.high %v695_v8, %v703_v9  ;;  %v688_v41 = vld [vmem:[%s3785_s23 + $0x158] sm:$0xff] }
  0xe8   : > { %3520 = vmatprep.subr.bf16.mxu0 %v3707_v10  ;;  %v523_v16 = vpack.c.bf16 %v521_v15, %v520_v14  ;;  %1124 = vmatprep.subr.bf16.mxu1 %v3154_v43  ;;  %v685_v49 = vld [vmem:[%s3785_s23 + $0x140] sm:$0xff]  ;;  %v670_v60 = vld [vmem:[%s3785_s23 + $0xc8] sm:$0xff]  ;;  %v647_v52 = vld [vmem:[%s3785_s23 + $0x10] sm:$0xff] }
  0xe9   : > { %1125 = vmatpush1.bf16.msra.mxu1 %v3153_v47  ;;  %v3138_v51 = vcombine.high %v677_v48, %v685_v49  ;;  %v3137_v55 = vcombine.low %v677_v48, %v685_v49  ;;  %v661_v56 = vld [vmem:[%s3785_s23 + $0x80] sm:$0xff]  ;;  %v3123_v61 = vcombine.low %v662_v58, %v670_v60  ;;  %v3124_v62 = vcombine.high %v662_v58, %v670_v60  ;;  %v646_v2 = vld [vmem:[%s3785_s23 + $0x8] sm:$0xff]  ;;  %v672_v47 = vld [vmem:[%s3785_s23 + $0xd8] sm:$0xff] }
  0xea   : > { %v669_v57 = vld [vmem:[%s3785_s23 + $0xc0] sm:$0xff]  ;;  %v654_v4 = vld [vmem:[%s3785_s23 + $0x48] sm:$0xff]  ;;  %v3143_v49 = vcombine.low %v680_v40, %v688_v41 }
  0xeb   : > { %3521 = vmatpush3.bf16.msra.mxu0 %v3560_v12  ;;  %1126 = vmatprep.subr.bf16.mxu1 %v3138_v51  ;;  %v3122_v59 = vcombine.high %v661_v56, %v669_v57  ;;  %v3121_v63 = vcombine.low %v661_v56, %v669_v57  ;;  %v645_v0 = vld [vmem:[%s3785_s23] sm:$0xff]  ;;  %v3107_v5 = vcombine.low %v646_v2, %v654_v4  ;;  %v704_v12 = vld [vmem:[%s3785_s23 + $0x1d8] sm:$0xff] }
  0xec   : > { %3522 = vmatprep.subr.bf16.mxu0 %v3707_v10  ;;  %v653_v1 = vld [vmem:[%s3785_s23 + $0x40] sm:$0xff]  ;;  %v3108_v6 = vcombine.high %v646_v2, %v654_v4  ;;  %v696_v10 = vld [vmem:[%s3785_s23 + $0x198] sm:$0xff] }
  0xed   : > { %1127 = vmatpush1.bf16.msra.mxu1 %v3137_v55  ;;  %v3106_v3 = vcombine.high %v645_v0, %v653_v1  ;;  %v3105_v7 = vcombine.low %v645_v0, %v653_v1  ;;  %v3159_v14 = vcombine.low %v696_v10, %v704_v12  ;;  %v3160_v15 = vcombine.high %v696_v10, %v704_v12  ;;  %v656_v55 = vld [vmem:[%s3785_s23 + $0x58] sm:$0xff]  ;;  %v697_v60 = vld [vmem:[%s3785_s23 + $0x1a0] sm:$0xff] }
  0xee   : > { %1128 = vmatprep.subr.bf16.mxu1 %v3122_v59  ;;  %v681_v4 = vld [vmem:[%s3785_s23 + $0x120] sm:$0xff] }
  0xef   : > { %3523 = vmatpush3.bf16.msra.mxu0 %v3561_v13  ;;  %v3157_v13 = vcombine.low %v695_v8, %v703_v9  ;;  %v665_v12 = vld [vmem:[%s3785_s23 + $0xa0] sm:$0xff] }
  0xf0   : > { %1167 = vmatprep.subr.bf16.mxu0 %v3156_v46  ;;  %v664_v46 = vld [vmem:[%s3785_s23 + $0x98] sm:$0xff] }
  0xf1   : > { %1129 = vmatpush1.bf16.msra.mxu1 %v3121_v63  ;;  %v3128_v51 = vcombine.high %v664_v46, %v672_v47  ;;  %v3127_v57 = vcombine.low %v664_v46, %v672_v47  ;;  %v706_v63 = vld [vmem:[%s3785_s23 + $0x1e8] sm:$0xff]  ;;  %v684_v46 = vld [vmem:[%s3785_s23 + $0x138] sm:$0xff] }
  0xf2   : > { %3525 = vmatmul.mubr.msk.bf16.vlgmr.msra.gmra.mxu0 %vm560_vm3, %v523_v16  ;;  %1130 = vmatprep.subr.bf16.mxu1 %v3106_v3  ;;  %v3709_v16 = vmov 0   ;;  %v692_v47 = vld [vmem:[%s3785_s23 + $0x178] sm:$0xff] }
  0xf3   : > { %1168 = vmatpush1.bf16.msra.mxu0 %v3155_v45  ;;  %1148 = vmatprep.mubr.bf16.mxu1 %v3709_v16  ;;  %v663_v45 = vld [vmem:[%s3785_s23 + $0x90] sm:$0xff] }
  0xf4   : > { %1169 = vmatprep.subr.bf16.mxu0 %v3140_v54  ;;  %1191 = vmatprep.mubr.bf16.mxu0 %v3709_v16  ;;  %v648_v54 = vld [vmem:[%s3785_s23 + $0x18] sm:$0xff] }
  0xf5   : > { %1131 = vmatpush1.bf16.msra.mxu1 %v3105_v7  ;;  %v3112_v59 = vcombine.high %v648_v54, %v656_v55  ;;  %v3111_v1 = vcombine.low %v648_v54, %v656_v55  ;;  %v690_v7 = vld [vmem:[%s3785_s23 + $0x168] sm:$0xff]  ;;  %v668_v54 = vld [vmem:[%s3785_s23 + $0xb8] sm:$0xff] }
  0xf6   : > { %1210 = vmatprep.subr.bf16.mxu1 %v3158_v11  ;;  %v676_v55 = vld [vmem:[%s3785_s23 + $0xf8] sm:$0xff] }
  0xf7   : > { %1170 = vmatpush1.bf16.msra.mxu0 %v3139_v53  ;;  %v655_v53 = vld [vmem:[%s3785_s23 + $0x50] sm:$0xff] }
  0xf8   : > { %1171 = vmatprep.subr.bf16.mxu0 %v3124_v62  ;;  %v3110_v58 = vcombine.high %v647_v52, %v655_v53  ;;  %v698_v62 = vld [vmem:[%s3785_s23 + $0x1a8] sm:$0xff]  ;;  %v3109_v0 = vcombine.low %v647_v52, %v655_v53  ;;  %v667_v52 = vld [vmem:[%s3785_s23 + $0xb0] sm:$0xff] }
  0xf9   : > { %v3164_v3 = vcombine.high %v698_v62, %v706_v63  ;;  %v3163_v9 = vcombine.low %v698_v62, %v706_v63  ;;  %v675_v53 = vld [vmem:[%s3785_s23 + $0xf0] sm:$0xff]  ;;  %v652_v62 = vld [vmem:[%s3785_s23 + $0x38] sm:$0xff] }
  0xfa   : > { %v660_v63 = vld [vmem:[%s3785_s23 + $0x78] sm:$0xff] }
  0xfb   : > { %1172 = vmatpush1.bf16.msra.mxu0 %v3123_v61  ;;  %v705_v61 = vld [vmem:[%s3785_s23 + $0x1e0] sm:$0xff] }
  0xfc   : > { %1173 = vmatprep.subr.bf16.mxu0 %v3108_v6  ;;  %v3162_v2 = vcombine.high %v697_v60, %v705_v61  ;;  %v682_v6 = vld [vmem:[%s3785_s23 + $0x128] sm:$0xff]  ;;  %v3161_v8 = vcombine.low %v697_v60, %v705_v61  ;;  %v651_v60 = vld [vmem:[%s3785_s23 + $0x30] sm:$0xff] }
  0xfd   : > { %v3148_v11 = vcombine.high %v682_v6, %v690_v7  ;;  %v659_v61 = vld [vmem:[%s3785_s23 + $0x70] sm:$0xff] }
  0xff   : > { %1174 = vmatpush1.bf16.msra.mxu0 %v3107_v5  ;;  %v689_v5 = vld [vmem:[%s3785_s23 + $0x160] sm:$0xff] }
 0x100   : > { %1253 = vmatprep.subr.bf16.mxu0 %v3160_v15  ;;  %v3146_v10 = vcombine.high %v681_v4, %v689_v5  ;;  %v674_v15 = vld [vmem:[%s3785_s23 + $0xe8] sm:$0xff] }
 0x1b2   : > { %v598_v22 = vpop.f32.mrf.mxu0 }
 0x1b3   : > { %v599_v23 = vadd.f32 %v598_v22, %v535_v21 }
 0x1b4   : > { %v3526_v24 = vpop.f32.mrf.mxu0 }
 0x1b5   : > { %v605_v25 = vsel %vm560_vm3, %v599_v23, 0.0 }
 0x1b6   : > { %606 = vadd.xlane.f32.xlu0 %v605_v25  ;;  %v601_v26 = vpop.f32.mrf.mxu0 }
 0x1b7   : > { %v602_v27 = vadd.f32 %v601_v26, %v535_v21  ;;  %v3868_v26 = vsub.s32 1, %v3823_v18 }
 0x1b8   : > { %v3527_v28 = vpop.f32.mrf.mxu0 }
 0x1b9   : > { %v608_v29 = vsel %vm560_vm3, %v602_v27, 0.0  ;;  %v3871_v28 = vsub.s32 2, %v3823_v18 }
 0x1ba   : > { %609 = vadd.xlane.f32.xlu0 %v608_v29  ;;  %v635_v29 = vrot.slane %v3829_v20, %v3868_v26 }
 0x23f   : > { %v607_v30 = vpop.xlane.xlu0 %606 }
 0x240   : > { %v612_v31 = vmul.f32 0.015625, %v607_v30 }
 0x242   : > { %v3835_v32 = vsub.f32 %v599_v23, %v612_v31 }
 0x243   : > { %v610_v33 = vpop.xlane.xlu0 %609 }
 0x244   : > { %v613_v34 = vmul.f32 0.015625, %v610_v33  ;;  %v616_v35 = vmul.f32 %v3835_v32, %v3835_v32  ;;  %v641_v33 = vrot.slane %v3829_v20, %v3871_v28  ;;  %v3144_v20 = vcombine.high %v680_v40, %v688_v41 }
 0x246   : > { %v3839_v36 = vsub.f32 %v602_v27, %v613_v34  ;;  %v618_v37 = vsel %vm560_vm3, %v616_v35, 0.0 }
 0x247   : > { %619 = vadd.xlane.f32.xlu1 %v618_v37 }
 0x248   : > { %v617_v38 = vmul.f32 %v3839_v36, %v3839_v36 }
 0x24a   : > { %v621_v39 = vsel %vm560_vm3, %v617_v38, 0.0  ;;  %v679_v38 = vld [vmem:[%s3785_s23 + $0x110] sm:$0xff] }
 0x24b   : > { %622 = vadd.xlane.f32.xlu1 %v621_v39  ;;  %v687_v39 = vld [vmem:[%s3785_s23 + $0x150] sm:$0xff] }
 0x24c   : > { %v3142_v44 = vcombine.high %v679_v38, %v687_v39  ;;  %v3141_v48 = vcombine.low %v679_v38, %v687_v39  ;;  %v700_v38 = vld [vmem:[%s3785_s23 + $0x1b8] sm:$0xff] }
 0x24d   : > { %v708_v39 = vld [vmem:[%s3785_s23 + $0x1f8] sm:$0xff] }
 0x2d0   : > { %v620_v17 = vpop.xlane.xlu1 %619 }
 0x2d1   : > { %v624_v21 = vmul.f32 0.015625, %v620_v17  ;;  %v3145_v17 = vcombine.low %v681_v4, %v689_v5  ;;  %v3117_v4 = vcombine.low %v651_v60, %v659_v61  ;;  %v3119_v5 = vcombine.low %v652_v62, %v660_v63 }
 0x2d3   : > { %v626_v22 = vadd.f32 1e-05, %v624_v21  ;;  %v3147_v21 = vcombine.low %v682_v6, %v690_v7  ;;  %v3563_v6 = vld [vmem:[%s3795_s11 + $0xf8] sm:$0xff]  }
 0x2d4   : > { %v623_v23 = vpop.xlane.xlu1 %622  ;;  %v3564_v7 = vld [vmem:[%s3795_s11 + $0x38] sm:$0xff]  }
 0x2d5   : > { %3690 = vrsqrt.f32 %v626_v22  ;;  %v625_v24 = vmul.f32 0.015625, %v623_v23 }
 0x2d7   : > { %v627_v25 = vadd.f32 1e-05, %v625_v24  ;;  %v649_v24 = vld [vmem:[%s3785_s23 + $0x20] sm:$0xff] }
 0x2d9   : > { %3692 = vrsqrt.f32 %v627_v25  ;;  %v657_v25 = vld [vmem:[%s3785_s23 + $0x60] sm:$0xff] }
 0x2da   : > { %v3113_v40 = vcombine.low %v649_v24, %v657_v25 }
 0x2e2   : > { %v3691_v27 = vpop.eup %3690 }
 0x2e3   : > { %v630_v30 = vmul.f32 %v3691_v27, %v3835_v32  ;;  %v650_v27 = vld [vmem:[%s3785_s23 + $0x28] sm:$0xff] }
 0x2e5   : > { %v636_v34 = vmul.f32 %v635_v29, %v630_v30 }
 0x2e6   : > { %v3693_v31 = vpop.eup %3692 }
 0x2e7   : > { %v631_v35 = vmul.f32 %v3693_v31, %v3839_v36  ;;  %v3883_v42 = vadd.f32 %v641_v33, %v636_v34  ;;  %v671_v36 = vld [vmem:[%s3785_s23 + $0xd0] sm:$0xff] }
 0x2e8   : > { %v3126_v50 = vcombine.high %v663_v45, %v671_v36  ;;  %v3125_v56 = vcombine.low %v663_v45, %v671_v36  ;;  %v683_v45 = vld [vmem:[%s3785_s23 + $0x130] sm:$0xff] }
 0x2e9   : > { %v637_v37 = vmul.f32 %v635_v29, %v631_v35  ;;  %v658_v29 = vld [vmem:[%s3785_s23 + $0x68] sm:$0xff]  ;;  %v699_v35 = vld [vmem:[%s3785_s23 + $0x1b0] sm:$0xff] }
 0x2ea   : > { %v3116_v34 = vcombine.high %v650_v27, %v658_v29  ;;  %v3115_v41 = vcombine.low %v650_v27, %v658_v29  ;;  %v691_v36 = vld [vmem:[%s3785_s23 + $0x170] sm:$0xff]  ;;  %v3580_v27 = vld [vmem:[%s3795_s11 + $0x18] sm:$0xff]  }
 0x2eb   : > { %v3885_v43 = vadd.f32 %v641_v33, %v637_v37  ;;  %v3114_v33 = vcombine.high %v649_v24, %v657_v25  ;;  %v707_v37 = vld [vmem:[%s3785_s23 + $0x1f0] sm:$0xff]  ;;  %v3578_v24 = vld [vmem:[%s3795_s11 + $0x58] sm:$0xff]  }
 0x2ec   : > { %v3579_v25 = vld [vmem:[%s3795_s11 + $0xd8] sm:$0xff]  }
 0x2ed   : > { %v3889_v32 = vpack.c.bf16 %v3885_v43, %v3883_v42  ;;  %v3581_v29 = vld [vmem:[%s3795_s11 + $0x98] sm:$0xff]  }
 0x2ef   : > { %3169 = vmatmul.mubr.msk.bf16.vlgmr.msra.gmra.mxu1 %vm560_vm3, %v3889_v32  ;;  %3170 = vmatmul.mubr.msk.bf16.vlgmr.msra.gmra.mxu0 %vm560_vm3, %v3889_v32 }
 0x2f0   : > { %1211 = vmatpush1.bf16.msra.mxu1 %v3157_v13  ;;  %1254 = vmatpush1.bf16.msra.mxu0 %v3159_v14  ;;  %v673_v13 = vld [vmem:[%s3785_s23 + $0xe0] sm:$0xff]  ;;  %v666_v14 = vld [vmem:[%s3785_s23 + $0xa8] sm:$0xff] }
 0x2f1   : > { %1212 = vmatprep.subr.bf16.mxu1 %v3142_v44  ;;  %1255 = vmatprep.subr.bf16.mxu0 %v3144_v20  ;;  %v3130_v22 = vcombine.high %v665_v12, %v673_v13  ;;  %v3132_v23 = vcombine.high %v666_v14, %v674_v15  ;;  %v3129_v30 = vcombine.low %v665_v12, %v673_v13  ;;  %v3569_v12 = vld [vmem:[%s3795_s11 + $0xb0] sm:$0xff]   ;;  %v3570_v13 = vld [vmem:[%s3795_s11 + $0x68] sm:$0xff]  }
 0x2f2   : > { %1234 = vmatprep.mubr.bf16.mxu1 %v3709_v16  ;;  %1277 = vmatprep.mubr.bf16.mxu0 %v3709_v16  ;;  %v3131_v31 = vcombine.low %v666_v14, %v674_v15  ;;  %v3166_v44 = vcombine.high %v699_v35, %v707_v37  ;;  %v3168_v20 = vcombine.high %v700_v38, %v708_v39  ;;  %v3571_v14 = vld [vmem:[%s3795_s11 + $0xe8] sm:$0xff]  }
 0x2f3   : > { %v3572_v15 = vld [vmem:[%s3795_s11 + $0x28] sm:$0xff]  }
 0x2f4   : > { %1213 = vmatpush1.bf16.msra.mxu1 %v3141_v48  ;;  %1256 = vmatpush1.bf16.msra.mxu0 %v3143_v49  ;;  %v3165_v48 = vcombine.low %v699_v35, %v707_v37  ;;  %v3167_v49 = vcombine.low %v700_v38, %v708_v39  ;;  %v3586_v35 = vld [vmem:[%s3795_s11 + $0x48] sm:$0xff]  }
 0x2f5   : > { %1214 = vmatprep.subr.bf16.mxu1 %v3126_v50  ;;  %1257 = vmatprep.subr.bf16.mxu0 %v3128_v51  ;;  %v3150_v50 = vcombine.high %v683_v45, %v691_v36  ;;  %v3152_v51 = vcombine.high %v684_v46, %v692_v47  ;;  %v3587_v37 = vld [vmem:[%s3795_s11 + $0xc8] sm:$0xff]  }
 0x2f6   : > { %v3588_v38 = vld [vmem:[%s3795_s11 + $0x8] sm:$0xff]  }
 0x2f7   : > { %v3589_v39 = vld [vmem:[%s3795_s11 + $0x88] sm:$0xff]  }
 0x2f8   : > { %1215 = vmatpush1.bf16.msra.mxu1 %v3125_v56  ;;  %1258 = vmatpush1.bf16.msra.mxu0 %v3127_v57  ;;  %v3149_v56 = vcombine.low %v683_v45, %v691_v36  ;;  %v3151_v57 = vcombine.low %v684_v46, %v692_v47  ;;  %v3594_v45 = vld [vmem:[%s3795_s11 + $0x178] sm:$0xff]   ;;  %v739_v46 = vsub.s32 6, %v3823_v18  ;;  %v3989_v47 = vld [vmem:[%s3790_s28 + $0x8] sm:$0xff] }
 0x2f9   : > { %1216 = vmatprep.subr.bf16.mxu1 %v3110_v58  ;;  %1259 = vmatprep.subr.bf16.mxu0 %v3112_v59  ;;  %v3134_v58 = vcombine.high %v667_v52, %v675_v53  ;;  %v3136_v59 = vcombine.high %v668_v54, %v676_v55  ;;  %v3595_v36 = vld [vmem:[%s3795_s11 + $0x1f8] sm:$0xff]  }
 0x2fc   : > { %1217 = vmatpush1.bf16.msra.mxu1 %v3109_v0  ;;  %1260 = vmatpush1.bf16.msra.mxu0 %v3111_v1  ;;  %v3133_v0 = vcombine.low %v667_v52, %v675_v53  ;;  %v3135_v1 = vcombine.low %v668_v54, %v676_v55 }
 0x2fd   : > { %1296 = vmatprep.subr.bf16.mxu1 %v3162_v2  ;;  %1339 = vmatprep.subr.bf16.mxu0 %v3164_v3  ;;  %v3118_v2 = vcombine.high %v651_v60, %v659_v61  ;;  %v3120_v3 = vcombine.high %v652_v62, %v660_v63 }
 0x2ff   : > { %3171 = vmatmul.mubr.msk.bf16.vlgmr.msra.gmra.mxu1 %vm560_vm3, %v3889_v32  ;;  %3172 = vmatmul.mubr.msk.bf16.vlgmr.msra.gmra.mxu0 %vm560_vm3, %v3889_v32 }
 0x300   : > { %1297 = vmatpush1.bf16.msra.mxu1 %v3161_v8  ;;  %1340 = vmatpush1.bf16.msra.mxu0 %v3163_v9  ;;  %v3565_v8 = vld [vmem:[%s3795_s11 + $0xb8] sm:$0xff]   ;;  %v3566_v9 = vld [vmem:[%s3795_s11 + $0x70] sm:$0xff]  }
 0x301   : > { %1298 = vmatprep.subr.bf16.mxu1 %v3146_v10  ;;  %1341 = vmatprep.subr.bf16.mxu0 %v3148_v11  ;;  %v3567_v10 = vld [vmem:[%s3795_s11 + $0xf0] sm:$0xff]  }
 0x302   : > { %1320 = vmatprep.mubr.bf16.mxu1 %v3709_v16  ;;  %1363 = vmatprep.mubr.bf16.mxu0 %v3709_v16  ;;  %v3568_v11 = vld [vmem:[%s3795_s11 + $0x30] sm:$0xff]  }
 0x304   : > { %1299 = vmatpush1.bf16.msra.mxu1 %v3145_v17  ;;  %1342 = vmatpush1.bf16.msra.mxu0 %v3147_v21  ;;  %v3573_v17 = vld [vmem:[%s3795_s11 + $0xa8] sm:$0xff]   ;;  %v3575_v21 = vld [vmem:[%s3795_s11 + $0xe0] sm:$0xff]  }
 0x305   : > { %1300 = vmatprep.subr.bf16.mxu1 %v3130_v22  ;;  %1343 = vmatprep.subr.bf16.mxu0 %v3132_v23  ;;  %v3576_v22 = vld [vmem:[%s3795_s11 + $0x20] sm:$0xff]  }
 0x306   : > { %v3577_v23 = vld [vmem:[%s3795_s11 + $0xa0] sm:$0xff]  }
 0x308   : > { %1301 = vmatpush1.bf16.msra.mxu1 %v3129_v30  ;;  %1344 = vmatpush1.bf16.msra.mxu0 %v3131_v31  ;;  %v3582_v30 = vld [vmem:[%s3795_s11 + $0x50] sm:$0xff]  }
 0x309   : > { %1302 = vmatprep.subr.bf16.mxu1 %v3114_v33  ;;  %1345 = vmatprep.subr.bf16.mxu0 %v3116_v34  ;;  %v3583_v31 = vld [vmem:[%s3795_s11 + $0xd0] sm:$0xff]  }
 0x30a   : > { %v3584_v33 = vld [vmem:[%s3795_s11 + $0x10] sm:$0xff]  }
 0x30b   : > { %v3585_v34 = vld [vmem:[%s3795_s11 + $0x90] sm:$0xff]  }
 0x30c   : > { %1303 = vmatpush1.bf16.msra.mxu1 %v3113_v40  ;;  %1346 = vmatpush1.bf16.msra.mxu0 %v3115_v41  ;;  %v3590_v40 = vld [vmem:[%s3795_s11 + $0x40] sm:$0xff]  }
 0x30d   : > { %1382 = vmatprep.subr.bf16.mxu1 %v3166_v44  ;;  %1425 = vmatprep.subr.bf16.mxu0 %v3168_v20  ;;  %v3591_v41 = vld [vmem:[%s3795_s11 + $0xc0] sm:$0xff]  }
 0x30e   : > { %v3592_v44 = vld [vmem:[%s3795_s11] sm:$0xff]  }
 0x30f   : > { %3173 = vmatmul.mubr.msk.bf16.vlgmr.msra.gmra.mxu1 %vm560_vm3, %v3889_v32  ;;  %3174 = vmatmul.mubr.msk.bf16.vlgmr.msra.gmra.mxu0 %vm560_vm3, %v3889_v32  ;;  %v3593_v20 = vld [vmem:[%s3795_s11 + $0x80] sm:$0xff]  }
 0x310   : > { %1383 = vmatpush1.bf16.msra.mxu1 %v3165_v48  ;;  %1426 = vmatpush1.bf16.msra.mxu0 %v3167_v49  ;;  %v3994_v48 = vrot.slane %v3989_v47, %v739_v46  ;;  %v3997_v49 = vsub.s32 3, %v3823_v18 }
 0x311   : > { %1384 = vmatprep.subr.bf16.mxu1 %v3150_v50  ;;  %1427 = vmatprep.subr.bf16.mxu0 %v3152_v51  ;;  %v4000_v50 = vld [vmem:[%s3790_s28] sm:$0xff] }
 0x312   : > { %1406 = vmatprep.mubr.bf16.mxu1 %v3709_v16  ;;  %1449 = vmatprep.mubr.bf16.mxu0 %v3709_v16  ;;  %v3562_v16 = vld [vmem:[%s3795_s11 + $0x78] sm:$0xff]   ;;  %v720_v53 = vrot.slane %v4000_v50, %v3868_v26  ;;  %v728_v54 = vrot.slane %v4000_v50, %v3997_v49  ;;  %v716_v55 = vrot.slane %v4000_v50, %v3826_v19 }
 0x314   : > { %1385 = vmatpush1.bf16.msra.mxu1 %v3149_v56  ;;  %1428 = vmatpush1.bf16.msra.mxu0 %v3151_v57  ;;  %v724_v56 = vrot.slane %v4000_v50, %v3871_v28 }
 0x315   : > { %1386 = vmatprep.subr.bf16.mxu1 %v3134_v58  ;;  %1429 = vmatprep.subr.bf16.mxu0 %v3136_v59 }
 0x318   : > { %1387 = vmatpush1.bf16.msra.mxu1 %v3133_v0  ;;  %1430 = vmatpush1.bf16.msra.mxu0 %v3135_v1 }
 0x319   : > { %1388 = vmatprep.subr.bf16.mxu1 %v3118_v2  ;;  %1431 = vmatprep.subr.bf16.mxu0 %v3120_v3 }
 0x31c   : > { %1389 = vmatpush1.bf16.msra.mxu1 %v3117_v4  ;;  %1432 = vmatpush1.bf16.msra.mxu0 %v3119_v5 }
 0x31d   : > { %3323 = vmatprep.subr.bf16.mxu1 %v3562_v16  ;;  %3345 = vmatprep.subr.bf16.mxu0 %v3563_v6 }
 0x31f   : > { %3175 = vmatmul.mubr.msk.bf16.vlgmr.msra.gmra.mxu1 %vm560_vm3, %v3889_v32  ;;  %3176 = vmatmul.mubr.msk.bf16.vlgmr.msra.gmra.mxu0 %vm560_vm3, %v3889_v32  ;;  %v3574_v32 = vld [vmem:[%s3795_s11 + $0x60] sm:$0xff]  }
 0x320   : > { %3324 = vmatpush3.bf16.msra.mxu1 %v3564_v7  ;;  %3346 = vmatpush3.bf16.msra.mxu0 %v3565_v8 }
 0x321   : > { %3325 = vmatprep.subr.bf16.mxu1 %v3566_v9  ;;  %3347 = vmatprep.subr.bf16.mxu0 %v3567_v10 }
 0x324   : > { %3326 = vmatpush3.bf16.msra.mxu1 %v3568_v11  ;;  %3348 = vmatpush3.bf16.msra.mxu0 %v3569_v12 }
 0x325   : > { %3327 = vmatprep.subr.bf16.mxu1 %v3570_v13  ;;  %3349 = vmatprep.subr.bf16.mxu0 %v3571_v14 }
 0x328   : > { %3328 = vmatpush3.bf16.msra.mxu1 %v3572_v15  ;;  %3350 = vmatpush3.bf16.msra.mxu0 %v3573_v17  ;;  %v3596_v17 = vld [vmem:[%s3795_s11 + $0x138] sm:$0xff]  }
 0x329   : > { %3329 = vmatprep.subr.bf16.mxu1 %v3574_v32  ;;  %3351 = vmatprep.subr.bf16.mxu0 %v3575_v21  ;;  %v3597_v32 = vld [vmem:[%s3795_s11 + $0x1b8] sm:$0xff]  }
 0x32c   : > { %3330 = vmatpush3.bf16.msra.mxu1 %v3576_v22  ;;  %3352 = vmatpush3.bf16.msra.mxu0 %v3577_v23  ;;  %v3598_v23 = vld [vmem:[%s3795_s11 + $0x170] sm:$0xff]  }
 0x32d   : > { %3331 = vmatprep.subr.bf16.mxu1 %v3578_v24  ;;  %3353 = vmatprep.subr.bf16.mxu0 %v3579_v25  ;;  %v3599_v24 = vld [vmem:[%s3795_s11 + $0x1f0] sm:$0xff]   ;;  %v4015_v25 = vsub.s32 5, %v3823_v18 }
 0x330   : > { %3332 = vmatpush3.bf16.msra.mxu1 %v3580_v27  ;;  %3354 = vmatpush3.bf16.msra.mxu0 %v3581_v29  ;;  %v743_v27 = vsub.s32 7, %v3823_v18  ;;  %v3600_v29 = vld [vmem:[%s3795_s11 + $0x130] sm:$0xff]  }
 0x331   : > { %3333 = vmatprep.subr.bf16.mxu1 %v3582_v30  ;;  %3355 = vmatprep.subr.bf16.mxu0 %v3583_v31  ;;  %v3601_v30 = vld [vmem:[%s3795_s11 + $0x1b0] sm:$0xff]  }
 0x334   : > { %3334 = vmatpush3.bf16.msra.mxu1 %v3584_v33  ;;  %3356 = vmatpush3.bf16.msra.mxu0 %v3585_v34  ;;  %v3602_v34 = vld [vmem:[%s3795_s11 + $0x168] sm:$0xff]  }
 0x335   : > { %3335 = vmatprep.subr.bf16.mxu1 %v3586_v35  ;;  %3357 = vmatprep.subr.bf16.mxu0 %v3587_v37  ;;  %v3603_v35 = vld [vmem:[%s3795_s11 + $0x1e8] sm:$0xff]   ;;  %v736_v37 = vrot.slane %v4000_v50, %v4015_v25 }
 0x338   : > { %3336 = vmatpush3.bf16.msra.mxu1 %v3588_v38  ;;  %3358 = vmatpush3.bf16.msra.mxu0 %v3589_v39  ;;  %v744_v38 = vrot.slane %v4000_v50, %v743_v27 }
 0x339   : > { %3337 = vmatprep.subr.bf16.mxu1 %v3590_v40  ;;  %3359 = vmatprep.subr.bf16.mxu0 %v3591_v41  ;;  %v3604_v41 = vld [vmem:[%s3795_s11 + $0x128] sm:$0xff]  }
 0x33c   : > { %3338 = vmatpush3.bf16.msra.mxu1 %v3592_v44  ;;  %3360 = vmatpush3.bf16.msra.mxu0 %v3593_v20  ;;  %v3605_v44 = vld [vmem:[%s3795_s11 + $0x1a8] sm:$0xff]  }
 0x33d   : > { %3367 = vmatprep.subr.bf16.mxu1 %v3594_v45  ;;  %3389 = vmatprep.subr.bf16.mxu0 %v3595_v36  ;;  %v3606_v36 = vld [vmem:[%s3795_s11 + $0x160] sm:$0xff]  }
 0x3af   : > { %v1150_v51 = vpop.f32.mrf.mxu1  ;;  %v1193_v52 = vpop.f32.mrf.mxu0 }
 0x3b0   : > { %v1151_v1 = vadd.f32 %v1150_v51, %v716_v55  ;;  %v1194_v2 = vadd.f32 %v1193_v52, %v724_v56  ;;  %v3607_v51 = vld [vmem:[%s3795_s11 + $0x1e0] sm:$0xff]  }
 0x3b1   : > { %v1152_v57 = vpop.f32.mrf.mxu1  ;;  %v1195_v58 = vpop.f32.mrf.mxu0 }
 0x3b2   : > { %v1153_v61 = vadd.f32 %v1152_v57, %v720_v53  ;;  %v1196_v62 = vadd.f32 %v1195_v58, %v728_v54  ;;  %v1460_v12 = vmax.f32 %v1151_v1, 0.0  ;;  %v1462_v13 = vmax.f32 %v1194_v2, 0.0  ;;  %v3608_v58 = vld [vmem:[%s3795_s11 + $0x120] sm:$0xff]  }
 0x3b3   : > { %v1154_v59 = vpop.f32.mrf.mxu1  ;;  %v1197_v60 = vpop.f32.mrf.mxu0 }
 0x3b4   : > { %v1155_v63 = vadd.f32 %v1154_v59, %v716_v55  ;;  %v1198_v0 = vadd.f32 %v1197_v60, %v724_v56  ;;  %v1461_v8 = vmax.f32 %v1153_v61, 0.0  ;;  %v1463_v9 = vmax.f32 %v1196_v62, 0.0  ;;  %v3609_v59 = vld [vmem:[%s3795_s11 + $0x1a0] sm:$0xff]   ;;  %v3610_v60 = vld [vmem:[%s3795_s11 + $0x158] sm:$0xff]  }
 0x3b5   : > { %v1156_v3 = vpop.f32.mrf.mxu1  ;;  %v1199_v4 = vpop.f32.mrf.mxu0  ;;  %v3611_v61 = vld [vmem:[%s3795_s11 + $0x1d8] sm:$0xff]  }
 0x3b6   : > { %v1157_v5 = vadd.f32 %v1156_v3, %v720_v53  ;;  %v1200_v16 = vadd.f32 %v1199_v4, %v728_v54  ;;  %v1476_v6 = vmax.f32 %v1155_v63, 0.0  ;;  %v1478_v7 = vmax.f32 %v1198_v0, 0.0  ;;  %v3612_v4 = vld [vmem:[%s3795_s11 + $0x118] sm:$0xff]  }
 0x3b8   : > { %v1477_v10 = vmax.f32 %v1157_v5, 0.0  ;;  %v1479_v11 = vmax.f32 %v1200_v16, 0.0  ;;  %v1492_v21 = vpack.c.bf16 %v1476_v6, %v1460_v12  ;;  %v1494_v22 = vpack.c.bf16 %v1478_v7, %v1462_v13  ;;  %v3613_v5 = vld [vmem:[%s3795_s11 + $0x198] sm:$0xff]   ;;  %v3614_v16 = vld [vmem:[%s3795_s11 + $0x150] sm:$0xff]   ;;  %v3618_v12 = vld [vmem:[%s3795_s11 + $0x148] sm:$0xff]  }
 0x3b9   : > { %v3615_v6 = vld [vmem:[%s3795_s11 + $0x1d0] sm:$0xff]   ;;  %v4044_v7 = vsub.s32 4, %v3823_v18  ;;  %v3619_v13 = vld [vmem:[%s3795_s11 + $0x1c8] sm:$0xff]   ;;  %v3658_v18 = vld [vmem:[%s3795_s11 + $0x378] sm:$0xff]  }
 0x3ba   : > { %v1493_v14 = vpack.c.bf16 %v1477_v10, %v1461_v8  ;;  %v1495_v15 = vpack.c.bf16 %v1479_v11, %v1463_v9  ;;  %v3616_v8 = vld [vmem:[%s3795_s11 + $0x110] sm:$0xff]  }
 0x3bb   : > { %v3617_v9 = vld [vmem:[%s3795_s11 + $0x190] sm:$0xff]  }
 0x3bc   : > { %2568 = vmatprep.mubr.bf16.mxu1 %v1493_v14  ;;  %2609 = vmatprep.mubr.bf16.mxu0 %v1495_v15  ;;  %v732_v14 = vrot.slane %v4000_v50, %v4044_v7  ;;  %v740_v15 = vrot.slane %v4000_v50, %v739_v46  ;;  %v3622_v50 = vld [vmem:[%s3795_s11 + $0x140] sm:$0xff]  }
 0x3bd   : > { %2569 = vmatmul.mubr.bf16.vlgmr.msra.gmra.mxu1 %v1492_v21  ;;  %2610 = vmatmul.mubr.bf16.vlgmr.msra.gmra.mxu0 %v1494_v22  ;;  %v752_v21 = vrot.slane %v3989_v47, %v3868_v26  ;;  %v3620_v22 = vld [vmem:[%s3795_s11 + $0x108] sm:$0xff]  }
 0x3be   : > { %3368 = vmatpush3.bf16.msra.mxu1 %v3596_v17  ;;  %3390 = vmatpush3.bf16.msra.mxu0 %v3597_v32 }
 0x3bf   : > { %v4020_v31 = vpop.f32.mrf.mxu1  ;;  %v4022_v33 = vpop.f32.mrf.mxu0  ;;  %3369 = vmatprep.subr.bf16.mxu1 %v3598_v23  ;;  %3391 = vmatprep.subr.bf16.mxu0 %v3599_v24  ;;  %v3621_v23 = vld [vmem:[%s3795_s11 + $0x188] sm:$0xff]  }
 0x3c0   : > { %v1237_v26 = vadd.f32 %v4020_v31, %v732_v14  ;;  %v3626_v31 = vld [vmem:[%s3795_s11 + $0x278] sm:$0xff]  }
 0x3c1   : > { %v1238_v39 = vpop.f32.mrf.mxu1  ;;  %v1281_v40 = vpop.f32.mrf.mxu0 }
 0x3c2   : > { %3370 = vmatpush3.bf16.msra.mxu1 %v3600_v29  ;;  %3392 = vmatpush3.bf16.msra.mxu0 %v3601_v30  ;;  %v1239_v52 = vadd.f32 %v1238_v39, %v736_v37  ;;  %v1282_v53 = vadd.f32 %v1281_v40, %v744_v38  ;;  %v760_v30 = vrot.slane %v3989_v47, %v3997_v49 }
 0x3c3   : > { %v1240_v20 = vpop.f32.mrf.mxu1  ;;  %v1283_v45 = vpop.f32.mrf.mxu0  ;;  %3371 = vmatprep.subr.bf16.mxu1 %v3602_v34  ;;  %3393 = vmatprep.subr.bf16.mxu0 %v3603_v35  ;;  %v3623_v35 = vld [vmem:[%s3795_s11 + $0x1c0] sm:$0xff]  }
 0x3c4   : > { %v1465_v62 = vmax.f32 %v1239_v52, 0.0  ;;  %v1467_v63 = vmax.f32 %v1282_v53, 0.0  ;;  %v1241_v24 = vadd.f32 %v1240_v20, %v732_v14  ;;  %v1284_v29 = vadd.f32 %v1283_v45, %v740_v15  ;;  %v3624_v20 = vld [vmem:[%s3795_s11 + $0x100] sm:$0xff]   ;;  %v3627_v53 = vld [vmem:[%s3795_s11 + $0x2f8] sm:$0xff]  }
 0x3c5   : > { %v1242_v54 = vpop.f32.mrf.mxu1  ;;  %v1285_v55 = vpop.f32.mrf.mxu0  ;;  %v3625_v45 = vld [vmem:[%s3795_s11 + $0x180] sm:$0xff]  }
 0x3c6   : > { %v1243_v56 = vadd.f32 %v1242_v54, %v736_v37  ;;  %v1286_v57 = vadd.f32 %v1285_v55, %v744_v38  ;;  %3372 = vmatpush3.bf16.msra.mxu1 %v3604_v41  ;;  %3394 = vmatpush3.bf16.msra.mxu0 %v3605_v44  ;;  %v1280_v37 = vadd.f32 %v4022_v33, %v740_v15  ;;  %v1464_v54 = vmax.f32 %v1237_v26, 0.0  ;;  %v3640_v14 = vld [vmem:[%s3795_s11 + $0x220] sm:$0xff]   ;;  %v3648_v26 = vld [vmem:[%s3795_s11 + $0x210] sm:$0xff]  }
 0x3c7   : > { %3373 = vmatprep.subr.bf16.mxu1 %v3606_v36  ;;  %3395 = vmatprep.subr.bf16.mxu0 %v3607_v51  ;;  %v1480_v36 = vmax.f32 %v1241_v24, 0.0  ;;  %v1482_v51 = vmax.f32 %v1284_v29, 0.0  ;;  %v3645_v29 = vld [vmem:[%s3795_s11 + $0x298] sm:$0xff]  }
 0x3c8   : > { %v1481_v0 = vmax.f32 %v1243_v56, 0.0  ;;  %v1483_v1 = vmax.f32 %v1286_v57, 0.0  ;;  %v1466_v55 = vmax.f32 %v1280_v37, 0.0 }
 0x3ca   : > { %v1497_v2 = vpack.c.bf16 %v1481_v0, %v1465_v62  ;;  %v1499_v3 = vpack.c.bf16 %v1483_v1, %v1467_v63  ;;  %3374 = vmatpush3.bf16.msra.mxu1 %v3608_v58  ;;  %3396 = vmatpush3.bf16.msra.mxu0 %v3609_v59  ;;  %v3628_v58 = vld [vmem:[%s3795_s11 + $0x238] sm:$0xff]   ;;  %v1496_v59 = vpack.c.bf16 %v1480_v36, %v1464_v54  ;;  %v3630_v0 = vld [vmem:[%s3795_s11 + $0x270] sm:$0xff]  }
 0x3cb   : > { %3375 = vmatprep.subr.bf16.mxu1 %v3610_v60  ;;  %3397 = vmatprep.subr.bf16.mxu0 %v3611_v61  ;;  %v1498_v60 = vpack.c.bf16 %v1482_v51, %v1466_v55  ;;  %v3629_v62 = vld [vmem:[%s3795_s11 + $0x2b8] sm:$0xff]   ;;  %v3631_v1 = vld [vmem:[%s3795_s11 + $0x2f0] sm:$0xff]   ;;  %v768_v51 = vrot.slane %v3989_v47, %v4015_v25 }
 0x3cc   : > { %2650 = vmatprep.mubr.bf16.mxu1 %v1497_v2  ;;  %2691 = vmatprep.mubr.bf16.mxu0 %v1499_v3  ;;  %v3632_v3 = vld [vmem:[%s3795_s11 + $0x230] sm:$0xff]  }
 0x3ce   : > { %3376 = vmatpush3.bf16.msra.mxu1 %v3612_v4  ;;  %3398 = vmatpush3.bf16.msra.mxu0 %v3613_v5  ;;  %v3633_v4 = vld [vmem:[%s3795_s11 + $0x2b0] sm:$0xff]   ;;  %v3634_v5 = vld [vmem:[%s3795_s11 + $0x268] sm:$0xff]  }
 0x3cf   : > { %v4048_v10 = vpop.f32.mrf.mxu1  ;;  %v4050_v11 = vpop.f32.mrf.mxu0  ;;  %3377 = vmatprep.subr.bf16.mxu1 %v3614_v16  ;;  %3399 = vmatprep.subr.bf16.mxu0 %v3615_v6  ;;  %v3635_v16 = vld [vmem:[%s3795_s11 + $0x2e8] sm:$0xff]  }
 0x3d0   : > { %v3636_v6 = vld [vmem:[%s3795_s11 + $0x228] sm:$0xff]  }
 0x3d1   : > { %v1324_v17 = vpop.f32.mrf.mxu1  ;;  %v1367_v32 = vpop.f32.mrf.mxu0 }
 0x3d2   : > { %3378 = vmatpush3.bf16.msra.mxu1 %v3616_v8  ;;  %3400 = vmatpush3.bf16.msra.mxu0 %v3617_v9  ;;  %v1325_v40 = vadd.f32 %v1324_v17, %v752_v21  ;;  %v1368_v52 = vadd.f32 %v1367_v32, %v760_v30  ;;  %v3637_v8 = vld [vmem:[%s3795_s11 + $0x2a8] sm:$0xff]   ;;  %v3638_v9 = vld [vmem:[%s3795_s11 + $0x260] sm:$0xff]   ;;  %v3642_v32 = vld [vmem:[%s3795_s11 + $0x258] sm:$0xff]  }
 0x3d3   : > { %v4065_v34 = vpop.f32.mrf.mxu1  ;;  %v4067_v46 = vpop.f32.mrf.mxu0  ;;  %3379 = vmatprep.subr.bf16.mxu1 %v3618_v12  ;;  %3401 = vmatprep.subr.bf16.mxu0 %v3619_v13  ;;  %v3639_v12 = vld [vmem:[%s3795_s11 + $0x2e0] sm:$0xff]  }
 0x3d4   : > { %v1469_v57 = vmax.f32 %v1325_v40, 0.0  ;;  %v1471_v61 = vmax.f32 %v1368_v52, 0.0  ;;  %v3641_v17 = vld [vmem:[%s3795_s11 + $0x2a0] sm:$0xff]   ;;  %v3651_v40 = vld [vmem:[%s3795_s11 + $0x2c8] sm:$0xff]  }
 0x3d5   : > { %v1328_v38 = vpop.f32.mrf.mxu1  ;;  %v1371_v39 = vpop.f32.mrf.mxu0 }
 0x3d6   : > { %v1329_v41 = vadd.f32 %v1328_v38, %v752_v21  ;;  %v1372_v44 = vadd.f32 %v1371_v39, %v760_v30  ;;  %3380 = vmatpush3.bf16.msra.mxu1 %v3620_v22  ;;  %3402 = vmatpush3.bf16.msra.mxu0 %v3621_v23  ;;  %v3643_v21 = vld [vmem:[%s3795_s11 + $0x2d8] sm:$0xff]   ;;  %v3646_v30 = vld [vmem:[%s3795_s11 + $0x250] sm:$0xff]   ;;  %v3650_v39 = vld [vmem:[%s3795_s11 + $0x248] sm:$0xff]  }
 0x3d7   : > { %3381 = vmatprep.subr.bf16.mxu1 %v3622_v50  ;;  %3403 = vmatprep.subr.bf16.mxu0 %v3623_v35  ;;  %v3644_v23 = vld [vmem:[%s3795_s11 + $0x218] sm:$0xff]   ;;  %v3647_v50 = vld [vmem:[%s3795_s11 + $0x2d0] sm:$0xff]  }
 0x3d8   : > { %v1485_v33 = vmax.f32 %v1329_v41, 0.0  ;;  %v1487_v56 = vmax.f32 %v1372_v44, 0.0  ;;  %v3649_v38 = vld [vmem:[%s3795_s11 + $0x290] sm:$0xff]   ;;  %v748_v41 = vrot.slane %v3989_v47, %v3826_v19  ;;  %v756_v44 = vrot.slane %v3989_v47, %v3871_v28 }
 0x3d9   : > { %v776_v28 = vrot.slane %v3989_v47, %v743_v27 }
 0x3da   : > { %3382 = vmatpush3.bf16.msra.mxu1 %v3624_v20  ;;  %3404 = vmatpush3.bf16.msra.mxu0 %v3625_v45  ;;  %v1501_v63 = vpack.c.bf16 %v1485_v33, %v1469_v57  ;;  %v1503_v2 = vpack.c.bf16 %v1487_v56, %v1471_v61  ;;  %v3652_v45 = vld [vmem:[%s3795_s11 + $0x208] sm:$0xff]   ;;  %v1327_v36 = vadd.f32 %v4065_v34, %v748_v41  ;;  %v3655_v33 = vld [vmem:[%s3795_s11 + $0x2c0] sm:$0xff]   ;;  %v3659_v61 = vld [vmem:[%s3795_s11 + $0x3f8] sm:$0xff]  }
 0x3db   : > { %3411 = vmatprep.subr.bf16.mxu1 %v3626_v31  ;;  %3433 = vmatprep.subr.bf16.mxu0 %v3627_v53  ;;  %v3653_v31 = vld [vmem:[%s3795_s11 + $0x288] sm:$0xff]   ;;  %v3654_v53 = vld [vmem:[%s3795_s11 + $0x240] sm:$0xff]   ;;  %v1370_v19 = vadd.f32 %v4067_v46, %v756_v44  ;;  %v1323_v34 = vadd.f32 %v4048_v10, %v748_v41  ;;  %v1366_v55 = vadd.f32 %v4050_v11, %v756_v44  ;;  %v3679_v41 = vld [vmem:[%s3795_s11 + $0x3d0] sm:$0xff]  }
 0x3dc   : > { %v3656_v57 = vld [vmem:[%s3795_s11 + $0x200] sm:$0xff]   ;;  %v3680_v44 = vld [vmem:[%s3795_s11 + $0x310] sm:$0xff]  }
 0x3dd   : > { %2651 = vmatmul.mubr.bf16.vlgmr.msra.gmra.mxu1 %v1496_v59  ;;  %2692 = vmatmul.mubr.bf16.vlgmr.msra.gmra.mxu0 %v1498_v60  ;;  %v3657_v46 = vld [vmem:[%s3795_s11 + $0x280] sm:$0xff]   ;;  %v1486_v27 = vmax.f32 %v1370_v19, 0.0  ;;  %v1468_v10 = vmax.f32 %v1323_v34, 0.0  ;;  %v1470_v11 = vmax.f32 %v1366_v55, 0.0 }
 0x3de   : > { %3412 = vmatpush3.bf16.msra.mxu1 %v3628_v58  ;;  %2732 = vmatprep.mubr.bf16.mxu1 %v1501_v63  ;;  %v1484_v58 = vmax.f32 %v1327_v36, 0.0  ;;  %v3683_v36 = vld [vmem:[%s3795_s11 + $0x3c8] sm:$0xff]   ;;  %v3686_v19 = vld [vmem:[%s3795_s11 + $0x340] sm:$0xff]  }
 0x3df   : > { %3434 = vmatpush3.bf16.msra.mxu0 %v3629_v62  ;;  %2773 = vmatprep.mubr.bf16.mxu0 %v1503_v2  ;;  %v4089_v13 = vpop.f32.mrf.mxu1  ;;  %v4092_v15 = vpop.f32.mrf.mxu0 }
 0x3e0   : > { %3413 = vmatprep.subr.bf16.mxu1 %v3630_v0  ;;  %3435 = vmatprep.subr.bf16.mxu0 %v3631_v1  ;;  %v3660_v0 = vld [vmem:[%s3795_s11 + $0x338] sm:$0xff]   ;;  %v1500_v1 = vpack.c.bf16 %v1484_v58, %v1468_v10 }
 0x3e1   : > { %v1410_v22 = vpop.f32.mrf.mxu1  ;;  %v1453_v24 = vpop.f32.mrf.mxu0 }
 0x3e2   : > { %3414 = vmatpush3.bf16.msra.mxu1 %v3632_v3  ;;  %v1411_v59 = vadd.f32 %v1410_v22, %v768_v51  ;;  %v1454_v60 = vadd.f32 %v1453_v24, %v776_v28  ;;  %v3661_v3 = vld [vmem:[%s3795_s11 + $0x3b8] sm:$0xff]   ;;  %v3669_v22 = vld [vmem:[%s3795_s11 + $0x3a8] sm:$0xff]   ;;  %v3671_v24 = vld [vmem:[%s3795_s11 + $0x3e0] sm:$0xff]  }
 0x3e3   : > { %3436 = vmatpush3.bf16.msra.mxu0 %v3633_v4  ;;  %3415 = vmatprep.subr.bf16.mxu1 %v3634_v5  ;;  %v4101_v35 = vpop.f32.mrf.mxu1  ;;  %v4104_v37 = vpop.f32.mrf.mxu0  ;;  %v1502_v4 = vpack.c.bf16 %v1486_v27, %v1470_v11 }
 0x3e4   : > { %3437 = vmatprep.subr.bf16.mxu0 %v3635_v16  ;;  %v1473_v2 = vmax.f32 %v1411_v59, 0.0  ;;  %v1475_v5 = vmax.f32 %v1454_v60, 0.0  ;;  %v3662_v16 = vld [vmem:[%s3795_s11 + $0x370] sm:$0xff]  }
 0x3e5   : > { %v1414_v20 = vpop.f32.mrf.mxu1  ;;  %v1457_v52 = vpop.f32.mrf.mxu0 }
 0x3e6   : > { %3416 = vmatpush3.bf16.msra.mxu1 %v3636_v6  ;;  %v1415_v54 = vadd.f32 %v1414_v20, %v768_v51  ;;  %v1458_v56 = vadd.f32 %v1457_v52, %v776_v28  ;;  %v3681_v20 = vld [vmem:[%s3795_s11 + $0x390] sm:$0xff]   ;;  %v764_v51 = vrot.slane %v3989_v47, %v4044_v7  ;;  %v3684_v52 = vld [vmem:[%s3795_s11 + $0x308] sm:$0xff]   ;;  %v1456_v28 = vadd.f32 %v4104_v37, %v3994_v48  ;;  %v3688_v47 = vld [vmem:[%s3795_s11 + $0x300] sm:$0xff]  }
 0x3e7   : > { %3438 = vmatpush3.bf16.msra.mxu0 %v3637_v8  ;;  %3417 = vmatprep.subr.bf16.mxu1 %v3638_v9  ;;  %v3663_v8 = vld [vmem:[%s3795_s11 + $0x3f0] sm:$0xff]  }
 0x3e8   : > { %3439 = vmatprep.subr.bf16.mxu0 %v3639_v12  ;;  %v1489_v62 = vmax.f32 %v1415_v54, 0.0  ;;  %v1491_v63 = vmax.f32 %v1458_v56, 0.0  ;;  %v3664_v12 = vld [vmem:[%s3795_s11 + $0x330] sm:$0xff]   ;;  %v1409_v34 = vadd.f32 %v4089_v13, %v764_v51  ;;  %v1452_v54 = vadd.f32 %v4092_v15, %v3994_v48 }
 0x3e9   : > { %v1490_v56 = vmax.f32 %v1456_v28, 0.0 }
 0x3ea   : > { %3418 = vmatpush3.bf16.msra.mxu1 %v3640_v14  ;;  %v1505_v6 = vpack.c.bf16 %v1489_v62, %v1473_v2  ;;  %v1507_v9 = vpack.c.bf16 %v1491_v63, %v1475_v5  ;;  %v3665_v14 = vld [vmem:[%s3795_s11 + $0x3b0] sm:$0xff]   ;;  %v1474_v58 = vmax.f32 %v1452_v54, 0.0 }
 0x3eb   : > { %3440 = vmatpush3.bf16.msra.mxu0 %v3641_v17  ;;  %3419 = vmatprep.subr.bf16.mxu1 %v3642_v32  ;;  %v3666_v17 = vld [vmem:[%s3795_s11 + $0x368] sm:$0xff]  }
 0x3ec   : > { %3441 = vmatprep.subr.bf16.mxu0 %v3643_v21  ;;  %v3667_v32 = vld [vmem:[%s3795_s11 + $0x3e8] sm:$0xff]   ;;  %v1506_v37 = vpack.c.bf16 %v1490_v56, %v1474_v58 }
 0x3ed   : > { %v3668_v21 = vld [vmem:[%s3795_s11 + $0x328] sm:$0xff]  }
 0x3ee   : > { %3420 = vmatpush3.bf16.msra.mxu1 %v3644_v23  ;;  %v3670_v23 = vld [vmem:[%s3795_s11 + $0x360] sm:$0xff]  }
 0x3ef   : > { %3442 = vmatpush3.bf16.msra.mxu0 %v3645_v29  ;;  %3421 = vmatprep.subr.bf16.mxu1 %v3646_v30  ;;  %v3672_v29 = vld [vmem:[%s3795_s11 + $0x320] sm:$0xff]  }
 0x3f0   : > { %3443 = vmatprep.subr.bf16.mxu0 %v3647_v50  ;;  %v3673_v30 = vld [vmem:[%s3795_s11 + $0x3a0] sm:$0xff]   ;;  %v3674_v50 = vld [vmem:[%s3795_s11 + $0x358] sm:$0xff]  }
 0x3f2   : > { %3422 = vmatpush3.bf16.msra.mxu1 %v3648_v26  ;;  %v3675_v26 = vld [vmem:[%s3795_s11 + $0x3d8] sm:$0xff]  }
 0x3f3   : > { %3444 = vmatpush3.bf16.msra.mxu0 %v3649_v38  ;;  %3423 = vmatprep.subr.bf16.mxu1 %v3650_v39  ;;  %v3676_v38 = vld [vmem:[%s3795_s11 + $0x318] sm:$0xff]  }
 0x3f4   : > { %3445 = vmatprep.subr.bf16.mxu0 %v3651_v40  ;;  %v3677_v39 = vld [vmem:[%s3795_s11 + $0x398] sm:$0xff]   ;;  %v3678_v40 = vld [vmem:[%s3795_s11 + $0x350] sm:$0xff]  }
 0x3f6   : > { %3424 = vmatpush3.bf16.msra.mxu1 %v3652_v45  ;;  %v3682_v45 = vld [vmem:[%s3795_s11 + $0x348] sm:$0xff]  }
 0x3f7   : > { %3446 = vmatpush3.bf16.msra.mxu0 %v3653_v31  ;;  %3425 = vmatprep.subr.bf16.mxu1 %v3654_v53  ;;  %v1413_v31 = vadd.f32 %v4101_v35, %v764_v51  ;;  %v3685_v53 = vld [vmem:[%s3795_s11 + $0x388] sm:$0xff]   ;;  %v3689_v35 = vld [vmem:[%s3795_s11 + $0x380] sm:$0xff]  }
 0x3f8   : > { %3447 = vmatprep.subr.bf16.mxu0 %v3655_v33  ;;  %v3687_v33 = vld [vmem:[%s3795_s11 + $0x3c0] sm:$0xff]  }
 0x3f9   : > { %v1488_v55 = vmax.f32 %v1413_v31, 0.0 }
 0x3fa   : > { %3426 = vmatpush3.bf16.msra.mxu1 %v3656_v57  ;;  %v1472_v57 = vmax.f32 %v1409_v34, 0.0 }
 0x3fb   : > { %3448 = vmatpush3.bf16.msra.mxu0 %v3657_v46  ;;  %3455 = vmatprep.subr.bf16.mxu1 %v3658_v18 }
 0x3fc   : > { %3477 = vmatprep.subr.bf16.mxu0 %v3659_v61  ;;  %v1504_v59 = vpack.c.bf16 %v1488_v55, %v1472_v57 }
 0x3fd   : > { %2733 = vmatmul.mubr.bf16.vlgmr.msra.gmra.mxu1 %v1500_v1 }
 0x3fe   : > { %2774 = vmatmul.mubr.bf16.vlgmr.msra.gmra.mxu0 %v1502_v4  ;;  %3456 = vmatpush3.bf16.msra.mxu1 %v3660_v0 }
 0x3ff   : > { %2814 = vmatprep.mubr.bf16.mxu1 %v1505_v6  ;;  %3478 = vmatpush3.bf16.msra.mxu0 %v3661_v3  ;;  %v4169_v3 = vld [vmem:[%s3800_s19] sm:$0xff] }
 0x400   : > { %2855 = vmatprep.mubr.bf16.mxu0 %v1507_v9  ;;  %3457 = vmatprep.subr.bf16.mxu1 %v3662_v16  ;;  %v1767_v4 = vrot.slane %v4169_v3, %v4015_v25 }
 0x401   : > { %3479 = vmatprep.subr.bf16.mxu0 %v3663_v8 }
 0x402   : > { %3458 = vmatpush3.bf16.msra.mxu1 %v3664_v12 }
 0x403   : > { %3480 = vmatpush3.bf16.msra.mxu0 %v3665_v14  ;;  %3459 = vmatprep.subr.bf16.mxu1 %v3666_v17 }
 0x404   : > { %3481 = vmatprep.subr.bf16.mxu0 %v3667_v32 }
 0x406   : > { %3460 = vmatpush3.bf16.msra.mxu1 %v3668_v21 }
 0x407   : > { %3482 = vmatpush3.bf16.msra.mxu0 %v3669_v22  ;;  %3461 = vmatprep.subr.bf16.mxu1 %v3670_v23 }
 0x408   : > { %3483 = vmatprep.subr.bf16.mxu0 %v3671_v24 }
 0x40a   : > { %3462 = vmatpush3.bf16.msra.mxu1 %v3672_v29 }
 0x40b   : > { %3484 = vmatpush3.bf16.msra.mxu0 %v3673_v30  ;;  %3463 = vmatprep.subr.bf16.mxu1 %v3674_v50 }
 0x40c   : > { %3485 = vmatprep.subr.bf16.mxu0 %v3675_v26 }
 0x40e   : > { %3464 = vmatpush3.bf16.msra.mxu1 %v3676_v38 }
 0x40f   : > { %3486 = vmatpush3.bf16.msra.mxu0 %v3677_v39  ;;  %3465 = vmatprep.subr.bf16.mxu1 %v3678_v40 }
 0x410   : > { %3487 = vmatprep.subr.bf16.mxu0 %v3679_v41 }
 0x412   : > { %3466 = vmatpush3.bf16.msra.mxu1 %v3680_v44 }
 0x413   : > { %3488 = vmatpush3.bf16.msra.mxu0 %v3681_v20  ;;  %3467 = vmatprep.subr.bf16.mxu1 %v3682_v45 }
 0x414   : > { %3489 = vmatprep.subr.bf16.mxu0 %v3683_v36 }
 0x416   : > { %3468 = vmatpush3.bf16.msra.mxu1 %v3684_v52 }
 0x417   : > { %3490 = vmatpush3.bf16.msra.mxu0 %v3685_v53  ;;  %3469 = vmatprep.subr.bf16.mxu1 %v3686_v19 }
 0x418   : > { %3491 = vmatprep.subr.bf16.mxu0 %v3687_v33 }
 0x41a   : > { %3470 = vmatpush3.bf16.msra.mxu1 %v3688_v47 }
 0x41b   : > { %3492 = vmatpush3.bf16.msra.mxu0 %v3689_v35 }
 0x41d   : > { %2815 = vmatmul.mubr.bf16.vlgmr.msra.gmra.mxu1 %v1504_v59 }
 0x41e   : > { %2856 = vmatmul.mubr.bf16.vlgmr.msra.gmra.mxu0 %v1506_v37 }
 0x47d   : > { %v3339_v13 = vpop.f32.mrf.mxu1  ;;  %v3361_v46 = vpop.f32.mrf.mxu0 }
 0x47f   : > { %v3340_v48 = vpop.f32.mrf.mxu1  ;;  %v3362_v15 = vpop.f32.mrf.mxu0 }
 0x480   : > { %v3341_v5 = vadd.f32 %v3340_v48, %v3339_v13  ;;  %v3363_v17 = vadd.f32 %v3362_v15, %v3361_v46 }
 0x481   : > { %v3342_v18 = vpop.f32.mrf.mxu1  ;;  %v3364_v27 = vpop.f32.mrf.mxu0 }
 0x482   : > { %v2571_v8 = vadd.f32 %v3341_v5, %v1767_v4 }
 0x483   : > { %v3343_v60 = vpop.f32.mrf.mxu1  ;;  %v3365_v10 = vpop.f32.mrf.mxu0 }
 0x484   : > { %v3344_v9 = vadd.f32 %v3343_v60, %v3342_v18  ;;  %v2612_v21 = vadd.f32 %v3363_v17, %v2571_v8  ;;  %v3366_v29 = vadd.f32 %v3365_v10, %v3364_v27 }
 0x486   : > { %v2574_v22 = vadd.f32 %v3344_v9, %v1767_v4 }
 0x488   : > { %v2615_v26 = vadd.f32 %v3366_v29, %v2574_v22  ;;  %v2901_v22 = vrot.slane %v4169_v3, %v4044_v7 }
 0x49d   : > { %v3383_v61 = vpop.f32.mrf.mxu1  ;;  %v3405_v62 = vpop.f32.mrf.mxu0 }
 0x49f   : > { %v3384_v11 = vpop.f32.mrf.mxu1  ;;  %v3406_v63 = vpop.f32.mrf.mxu0 }
 0x4a0   : > { %v3385_v32 = vadd.f32 %v3384_v11, %v3383_v61  ;;  %v3407_v38 = vadd.f32 %v3406_v63, %v3405_v62 }
 0x4a1   : > { %v3386_v0 = vpop.f32.mrf.mxu1  ;;  %v3408_v1 = vpop.f32.mrf.mxu0 }
 0x4a2   : > { %v2653_v30 = vadd.f32 %v3385_v32, %v2612_v21  ;;  %v2895_v32 = vrot.slane %v4169_v3, %v3997_v49 }
 0x4a3   : > { %v3387_v2 = vpop.f32.mrf.mxu1  ;;  %v3409_v6 = vpop.f32.mrf.mxu0 }
 0x4a4   : > { %v3388_v50 = vadd.f32 %v3387_v2, %v3386_v0  ;;  %v2694_v41 = vadd.f32 %v3407_v38, %v2653_v30  ;;  %v3410_v20 = vadd.f32 %v3409_v6, %v3408_v1 }
 0x4a6   : > { %v2656_v44 = vadd.f32 %v3388_v50, %v2615_v26 }
 0x4a8   : > { %v2697_v31 = vadd.f32 %v3410_v20, %v2656_v44 }
 0x4bd   : > { %v3427_v16 = vpop.f32.mrf.mxu1 }
 0x4be   : > { %v3449_v12 = vpop.f32.mrf.mxu0 }
 0x4bf   : > { %v3428_v14 = vpop.f32.mrf.mxu1 }
 0x4c0   : > { %v3450_v23 = vpop.f32.mrf.mxu0  ;;  %v3429_v39 = vadd.f32 %v3428_v14, %v3427_v16 }
 0x4c1   : > { %v3430_v24 = vpop.f32.mrf.mxu1  ;;  %v3451_v53 = vadd.f32 %v3450_v23, %v3449_v12 }
 0x4c2   : > { %v3452_v25 = vpop.f32.mrf.mxu0  ;;  %v2735_v45 = vadd.f32 %v3429_v39, %v2694_v41 }
 0x4c3   : > { %v3431_v40 = vpop.f32.mrf.mxu1 }
 0x4c4   : > { %v3432_v36 = vadd.f32 %v3431_v40, %v3430_v24  ;;  %v3453_v51 = vpop.f32.mrf.mxu0  ;;  %v2776_v33 = vadd.f32 %v3451_v53, %v2735_v45 }
 0x4c5   : > { %v3454_v35 = vadd.f32 %v3453_v51, %v3452_v25 }
 0x4c6   : > { %v2738_v34 = vadd.f32 %v3432_v36, %v2697_v31 }
 0x4c8   : > { %v2779_v37 = vadd.f32 %v3454_v35, %v2738_v34 }
 0x4dd   : > { %v3471_v52 = vpop.f32.mrf.mxu1 }
 0x4de   : > { %v3493_v19 = vpop.f32.mrf.mxu0 }
 0x4df   : > { %v3472_v28 = vpop.f32.mrf.mxu1 }
 0x4e0   : > { %v3473_v54 = vadd.f32 %v3472_v28, %v3471_v52  ;;  %v3494_v47 = vpop.f32.mrf.mxu0 }
 0x4e1   : > { %v3474_v55 = vpop.f32.mrf.mxu1  ;;  %v3495_v57 = vadd.f32 %v3494_v47, %v3493_v19 }
 0x4e2   : > { %v2817_v56 = vadd.f32 %v3473_v54, %v2776_v33  ;;  %v3496_v58 = vpop.f32.mrf.mxu0 }
 0x4e3   : > { %v3475_v59 = vpop.f32.mrf.mxu1 }
 0x4e4   : > { %v2858_v13 = vadd.f32 %v3495_v57, %v2817_v56  ;;  %v3476_v46 = vadd.f32 %v3475_v59, %v3474_v55  ;;  %v3497_v48 = vpop.f32.mrf.mxu0 }
 0x4e5   : > { %v3498_v18 = vadd.f32 %v3497_v48, %v3496_v58 }
 0x4e6   : > { %v2820_v15 = vadd.f32 %v3476_v46, %v2779_v37  ;;  %v2864_v27 = vadd.f32 %v2858_v13, %v3883_v42 }
 0x4e8   : > { %v2861_v60 = vadd.f32 %v3498_v18, %v2820_v15  ;;  %v2866_v61 = vsel %vm560_vm3, %v2864_v27, 0.0 }
 0x4e9   : > { %2867 = vadd.xlane.f32.xlu0 %v2866_v61 }
 0x4ea   : > { %v2865_v10 = vadd.f32 %v2861_v60, %v3885_v43 }
 0x4ec   : > { %v2869_v62 = vsel %vm560_vm3, %v2865_v10, 0.0 }
 0x4ed   : > { %2870 = vadd.xlane.f32.xlu1 %v2869_v62 }
 0x572   : > { %v2868_v11 = vpop.xlane.xlu0 %2867 }
 0x573   : > { %v2872_v63 = vmul.f32 0.015625, %v2868_v11 }
 0x575   : > { %v2874_v0 = vsub.f32 %v2864_v27, %v2872_v63 }
 0x576   : > { %v2871_v1 = vpop.xlane.xlu1 %2870 }
 0x577   : > { %v2873_v2 = vmul.f32 0.015625, %v2871_v1  ;;  %v2876_v4 = vmul.f32 %v2874_v0, %v2874_v0 }
 0x579   : > { %v2875_v5 = vsub.f32 %v2865_v10, %v2873_v2  ;;  %v2878_v16 = vsel %vm560_vm3, %v2876_v4, 0.0 }
 0x57a   : > { %2879 = vadd.xlane.f32.xlu0 %v2878_v16 }
 0x57b   : > { %v2877_v42 = vmul.f32 %v2875_v5, %v2875_v5 }
 0x57d   : > { %v2881_v6 = vsel %vm560_vm3, %v2877_v42, 0.0 }
 0x57e   : > { %2882 = vadd.xlane.f32.xlu1 %v2881_v6 }
 0x603   : > { %v2880_v8 = vpop.xlane.xlu0 %2879 }
 0x604   : > { %v2884_v9 = vmul.f32 0.015625, %v2880_v8 }
 0x606   : > { %v2886_v43 = vadd.f32 1e-05, %v2884_v9 }
 0x607   : > { %v2883_v12 = vpop.xlane.xlu1 %2882 }
 0x608   : > { %3694 = vrsqrt.f32 %v2886_v43  ;;  %v2885_v14 = vmul.f32 0.015625, %v2883_v12 }
 0x60a   : > { %v2887_v17 = vadd.f32 1e-05, %v2885_v14 }
 0x60c   : > { %3696 = vrsqrt.f32 %v2887_v17 }
 0x615   : > { %v3695_v21 = vpop.eup %3694 }
 0x616   : > { %v2890_v23 = vmul.f32 %v3695_v21, %v2874_v0 }
 0x618   : > { %v2896_v24 = vmul.f32 %v2895_v32, %v2890_v23 }
 0x619   : > { %v3697_v29 = vpop.eup %3696 }
 0x61a   : > { %v2902_v30 = vadd.f32 %v2901_v22, %v2896_v24  ;;  %v2891_v50 = vmul.f32 %v3697_v29, %v2875_v5 }
 0x61c   : > { %2904 = vst.msk [vmem:[#allocation2] sm:$0xff] %vm560_vm3, %v2902_v30  ;;  %v2897_v26 = vmul.f32 %v2895_v32, %v2891_v50  ;;  %2909 = sbr.rel (%p3305_p5) target bundleno = 1784 (0x6f8), region = 68 }
 0x61e   : > { %v2903_v38 = vadd.f32 %v2901_v22, %v2897_v26 }
 0x620   : > { %2905 = vst.msk [vmem:[#allocation2 + $0x8] sm:$0xff] %vm560_vm3, %v2903_v38 }
 0x621   : > { %v2917_v49 = vld [vmem:[%s4232_s8 + $0x38] sm:$0xff]  ;;  %v2916_v7 = vld [vmem:[%s4232_s8 + $0x30] sm:$0xff]  ;;  %3544 = vmatprep.mubr.msk.f32.mxu0 %vm560_vm3, %v2902_v30  ;;  %v2915_v3 = vld [vmem:[%s4232_s8 + $0x28] sm:$0xff] }
 0x622   : > { %3528 = vmatprep.subr.mxu0 %v2917_v49  ;;  %v2914_v39 = vld [vmem:[%s4232_s8 + $0x20] sm:$0xff]  ;;  %v2913_v25 = vld [vmem:[%s4232_s8 + $0x18] sm:$0xff]  ;;  %v2912_v40 = vld [vmem:[%s4232_s8 + $0x10] sm:$0xff] }
 0x623   : > { %3529 = vmatpush3.msra.mxu0 %v2917_v49  ;;  %v2911_v41 = vld [vmem:[%s4232_s8 + $0x8] sm:$0xff]  ;;  %v2910_v44 = vld [vmem:[%s4232_s8] sm:$0xff] }
 0x624   : > { %3530 = vmatprep.subr.mxu0 %v2916_v7  ;;  %v3306_v20 = vld [vmem:[%s4233_s9] ss:$0 sm:$0xff] }
 0x625   : > { %3531 = vmatpush3.msra.mxu0 %v2916_v7 }
 0x626   : > { %3532 = vmatprep.subr.mxu0 %v2915_v3 }
 0x627   : > { %3533 = vmatpush3.msra.mxu0 %v2915_v3 }
 0x628   : > { %3534 = vmatprep.subr.mxu0 %v2914_v39 }
 0x629   : > { %3535 = vmatpush3.msra.mxu0 %v2914_v39 }
 0x62a   : > { %3536 = vmatprep.subr.mxu0 %v2913_v25 }
 0x62b   : > { %3537 = vmatpush3.msra.mxu0 %v2913_v25 }
 0x62c   : > { %3538 = vmatprep.subr.mxu0 %v2912_v40 }
 0x62d   : > { %3539 = vmatpush3.msra.mxu0 %v2912_v40 }
 0x62e   : > { %3540 = vmatprep.subr.mxu0 %v2911_v41 }
 0x62f   : > { %3541 = vmatpush3.msra.mxu0 %v2911_v41 }
 0x630   : > { %3542 = vmatprep.subr.mxu0 %v2910_v44 }
 0x631   : > { %3543 = vmatpush3.msra.mxu0 %v2910_v44 }
 0x632   : > { %3545 = vmatmul.mubr.msk.f32.vlgmr.msra.gmra.mxu0 %vm560_vm3, %v2903_v38 }
 0x6f2   : > { %v3546_v45 = vpop.f32.mrf.mxu0 }
 0x6f3   : > { %v3003_v36 = vadd.f32 %v3546_v45, %v3306_v20 }
 0x6f4   : > { %v2997_v51 = vpop.f32.mrf.mxu0 }
 0x6f5   : > { %3007 = vst [vmem:[%s4234_s10 + $0x8] sm:$0xff] %v3003_v36  ;;  %v2998_v52 = vadd.f32 %v3306_v20, %v2997_v51 }
 0x6f7   : > { %3006 = vst [vmem:[%s4234_s10] sm:$0xff] %v2998_v52 }
 0x6f8 PF: > { %s20_s13 = sadd.s32 1, %s3705_s13  }
 0x6f9   : > { %p17_p6 = scmp.ge.s32.totalorder %s20_s13, 6  }
 0x6fb   :  { %19 = sbr.rel (!%p17_p6) target bundleno = 1 (0x1), region = 106 }

</bundles_post_ra>
